<compile_context>
chip_gen: v5e
topology: v5e:2x2
jax: 0.10.0
libtpu: 0.0.40
codegen_flags: <defaults>
</compile_context>

<pallas_src>
import math

import jax
import jax.numpy as jnp
from jax import lax
from jax.experimental import pallas as pl
from jax.experimental.pallas import tpu as pltpu


_INV_SQRT2 = 1.0 / math.sqrt(2.0)

# EUP approximate reciprocal inside the erf rational term (perf-review item).
# Flip to False for a bit-exact-ish (<~1e-6) match to the erf GELU reference.
_APPROX_RCP = True

# Python-unroll the ResBlock chain up to this R; beyond it use lax.fori_loop
# with dynamic weight-ref indexing (perf-review item on scaling R).
_UNROLL_RES = 4


def _erf(z):
    # Abramowitz & Stegun 7.1.26, |error| <= 1.5e-7; exp -> EUP, rcp -> EUP.
    # TODO(synk): switch to lax.erf if/when Mosaic lowers erf_p directly.
    a1, a2, a3, a4, a5 = (0.254829592, -0.284496736, 1.421413741,
                          -1.453152027, 1.061405429)
    p = 0.3275911
    az = jnp.abs(z)
    t = pl.reciprocal(1.0 + p * az, approx=_APPROX_RCP)
    poly = t * (a1 + t * (a2 + t * (a3 + t * (a4 + t * a5))))
    e = 1.0 - poly * jnp.exp(-az * az)
    return jnp.where(z < 0.0, -e, e)


def _gelu_exact(v):
    # Matches PyTorch nn.GELU() default (erf-based).
    return 0.5 * v * (1.0 + _erf(v * _INV_SQRT2))


def _make_dblock_kernel(H, W, P, R):
    """P = (images packed per tile) * C, stacked on the sublane axis."""
    HW = H * W

    def kernel(x_ref, dw1_ref, pw1_ref, b1_ref, dw2_ref, pw2_ref, b2_ref,
               o_ref):
        # x_ref/o_ref : (P, HW)    packed images; channels on sublanes, H*W lanes
        # dw*_ref     : (R, P, 9)  depthwise 3x3 taps (replicated per image)
        # pw*_ref     : (R, P, P)  block-diagonal pointwise weights
        # b*_ref      : (R, P, 1)  fused bias (pw @ b_dw + b_pw), replicated
        x = x_ref[...].astype(jnp.float32)                 # (P, HW)

        # --- 3x3 boundary masks: generated in-kernel from an iota, hoisted &
        # pre-broadcast once to the full (P, HW) tile, shared by all 2R convs.
        lane = lax.broadcasted_iota(jnp.int32, (P, HW), 1)
        if (W & (W - 1)) == 0:
            col = lane & (W - 1)                           # cheap pow-2 path
        else:
            col = lane % W  # TODO(synk): verify Mosaic vector s32 rem for non-pow2 W
        row_ok = {-1: lane >= W, 1: lane < (H - 1) * W}    # r-1>=0 / r+1<=H-1
        col_ok = {-1: col >= 1, 1: col <= W - 2}           # c-1>=0 / c+1<=W-1
        masks = {}
        for di in (-1, 0, 1):
            for dj in (-1, 0, 1):
                if di == 0 and dj == 0:
                    continue
                m = None
                if di != 0:
                    m = row_ok[di]
                if dj != 0:
                    m = col_ok[dj] if m is None else (m & col_ok[dj])
                masks[(di, dj)] = m.astype(jnp.float32)    # (P, HW)

        def dwsep(v, dw, pw, b):
            # v: (P, HW); dw: (P, 9); pw: (P, P) block-diag; b: (P, 1).
            acc = jnp.zeros((P, HW), jnp.float32)
            for ki in range(3):
                for kj in range(3):
                    di, dj = ki - 1, kj - 1
                    s = di * W + dj                        # source lane offset
                    t = ki * 3 + kj
                    # result[p] = v[p + s]; wrap-around lanes are masked off.
                    shifted = v if s == 0 else pltpu.roll(v, (-s) % HW, axis=1)
                    if di != 0 or dj != 0:
                        shifted = shifted * masks[(di, dj)]
                    acc = acc + shifted * dw[:, t:t + 1]
            # 1x1 pointwise conv on the MXU (vex slot); f32 in/out, f32 acc.
            y = jnp.dot(pw, acc, preferred_element_type=jnp.float32)
            return y + b

        def resblock(r, h):
            y = dwsep(h, dw1_ref[r], pw1_ref[r], b1_ref[r])
            y = _gelu_exact(y)
            y = dwsep(y, dw2_ref[r], pw2_ref[r], b2_ref[r])
            return y + h                                   # residual

        if R <= _UNROLL_RES:
            h = x
            for r in range(R):                             # static unroll
                h = resblock(r, h)
        else:
            # Bounded live ranges / code size for large R.
            h = lax.fori_loop(0, R, resblock, x)

        o_ref[...] = h.astype(o_ref.dtype)

    return kernel


def dblock_forward(x_nchw, params):
    """DBlock forward pass.

    x_nchw : (N, C, H, W) float32.
    params : list (length num_res) of dicts with PyTorch-layout tensors:
             dw1_w (C,1,3,3), dw1_b (C,), pw1_w (C,C,1,1), pw1_b (C,),
             dw2_w (C,1,3,3), dw2_b (C,), pw2_w (C,C,1,1), pw2_b (C,).
    """
    N, C, H, W = x_nchw.shape
    HW = H * W
    R = len(params)

    # Pack 2 images per grid step so the tile fills the 8 f32 sublanes
    # (review item 1); fall back to 1 for odd batch sizes.
    pack = 2 if N % 2 == 0 else 1
    P = pack * C

    eye_p = jnp.eye(pack, dtype=jnp.float32)

    def prep(dw_w, dw_b, pw_w, pw_b):
        dw = dw_w.reshape(C, 9).astype(jnp.float32)        # [c, ki*3+kj]
        pw = pw_w.reshape(C, C).astype(jnp.float32)        # [c_out, c_in]
        # Fold depthwise bias through the (linear) pointwise conv.
        b = (pw @ dw_b.astype(jnp.float32)
             + pw_b.astype(jnp.float32)).reshape(C, 1)
        # Replicate per-channel taps / bias for the packed images; make the
        # pointwise block-diagonal so one MXU matmul serves the whole pack.
        return (jnp.tile(dw, (pack, 1)),                   # (P, 9)
                jnp.kron(eye_p, pw),                       # (P, P)
                jnp.tile(b, (pack, 1)))                    # (P, 1)

    stacks = [[], [], [], [], [], []]
    for prm in params:
        d1, p1, bb1 = prep(prm["dw1_w"], prm["dw1_b"], prm["pw1_w"], prm["pw1_b"])
        d2, p2, bb2 = prep(prm["dw2_w"], prm["dw2_b"], prm["pw2_w"], prm["pw2_b"])
        for lst, v in zip(stacks, (d1, p1, bb1, d2, p2, bb2)):
            lst.append(v)
    dw1, pw1, b1, dw2, pw2, b2 = (jnp.stack(s) for s in stacks)

    # Free reshape: merges (2 images, C) onto the sublane axis, (H, W) onto
    # the lane axis.  No transpose / pad pass over HBM.
    x = x_nchw.reshape(N // pack, P, HW)

    full3 = lambda n: (0, 0, 0)
    # TODO(synk): at production scale, single-buffer the grid-invariant weight
    # specs (pipeline_mode=pl.Buffered(1)) and raise vmem_limit_bytes when an
    # H-tile axis (with a 2R-row halo) is added for large images.
    out = pl.pallas_call(
        _make_dblock_kernel(H, W, P, R),
        out_shape=jax.ShapeDtypeStruct((N // pack, P, HW), x_nchw.dtype),
        grid=(N // pack,),
        in_specs=[
            pl.BlockSpec((None, P, HW), lambda n: (n, 0, 0)),  # packed images
            pl.BlockSpec((R, P, 9), full3),                    # dw1
            pl.BlockSpec((R, P, P), full3),                    # pw1 (block-diag)
            pl.BlockSpec((R, P, 1), full3),                    # b1 (fused)
            pl.BlockSpec((R, P, 9), full3),                    # dw2
            pl.BlockSpec((R, P, P), full3),                    # pw2 (block-diag)
            pl.BlockSpec((R, P, 1), full3),                    # b2 (fused)
        ],
        out_specs=pl.BlockSpec((None, P, HW), lambda n: (n, 0, 0)),
        compiler_params=pltpu.CompilerParams(
            dimension_semantics=("parallel",)),
    )(x, dw1, pw1, b1, dw2, pw2, b2)

    return out.reshape(N, C, H, W)


# ----------------------------- pure-JAX reference -----------------------------

def _dwsep_reference(x, dw_w, dw_b, pw_w, pw_b):
    C = x.shape[1]
    y = lax.conv_general_dilated(
        x, dw_w, window_strides=(1, 1), padding=((1, 1), (1, 1)),
        dimension_numbers=("NCHW", "OIHW", "NCHW"),
        feature_group_count=C, precision=lax.Precision.HIGHEST)
    y = y + dw_b[None, :, None, None]
    z = lax.conv_general_dilated(
        y, pw_w, window_strides=(1, 1), padding=((0, 0), (0, 0)),
        dimension_numbers=("NCHW", "OIHW", "NCHW"),
        precision=lax.Precision.HIGHEST)
    return z + pw_b[None, :, None, None]


def _dblock_reference(x, params):
    """Matches the PyTorch DBlock: num_res x (dwsep -> GELU -> dwsep) + skip."""
    for p in params:
        y = _dwsep_reference(x, p["dw1_w"], p["dw1_b"], p["pw1_w"], p["pw1_b"])
        y = jax.nn.gelu(y, approximate=False)        # nn.GELU() default (erf)
        y = _dwsep_reference(y, p["dw2_w"], p["dw2_b"], p["pw2_w"], p["pw2_b"])
        x = y + x
    return x


if __name__ == "__main__":
    N, C, H, W, num_res = 2, 4, 16, 16, 2

    key = jax.random.PRNGKey(0)
    params = []
    for _ in range(num_res):
        key, *ks = jax.random.split(key, 9)
        params.append(dict(
            dw1_w=jax.random.normal(ks[0], (C, 1, 3, 3), jnp.float32) * 0.2,
            dw1_b=jax.random.normal(ks[1], (C,), jnp.float32) * 0.1,
            pw1_w=jax.random.normal(ks[2], (C, C, 1, 1), jnp.float32) * 0.2,
            pw1_b=jax.random.normal(ks[3], (C,), jnp.float32) * 0.1,
            dw2_w=jax.random.normal(ks[4], (C, 1, 3, 3), jnp.float32) * 0.2,
            dw2_b=jax.random.normal(ks[5], (C,), jnp.float32) * 0.1,
            pw2_w=jax.random.normal(ks[6], (C, C, 1, 1), jnp.float32) * 0.2,
            pw2_b=jax.random.normal(ks[7], (C,), jnp.float32) * 0.1,
        ))
    key, kx = jax.random.split(key)
    x = jax.random.normal(kx, (N, C, H, W), jnp.float32)

    fwd = jax.jit(dblock_forward)
    out = jax.block_until_ready(fwd(x, params))
    ref = _dblock_reference(x, params)

    assert out.shape == (N, C, H, W)
    # With _APPROX_RCP the EUP reciprocal inside the erf contributes up to
    # ~1e-3 abs error through 2 ResBlocks; with it off the kernel matches the
    # erf-exact reference to ~1e-6.
    tol = 2e-3 if _APPROX_RCP else 2e-4
    max_err = float(jnp.max(jnp.abs(out - ref)))
    assert jnp.allclose(out, ref, atol=tol, rtol=tol), (
        f"mismatch vs reference (max abs err {max_err:.3e}, tol {tol:.1e})")
    print("KERNEL_OK")
</pallas_src>

<mosaic_0001>
module attributes {stable_mosaic.version = 11 : i64} {
  func.func @kernel(%arg0: i32, %arg1: memref<1x8x256xf32, #tpu.memory_space<vmem>>, %arg2: memref<2x8x9xf32, #tpu.memory_space<vmem>>, %arg3: memref<2x8x8xf32, #tpu.memory_space<vmem>>, %arg4: memref<2x8x1xf32, #tpu.memory_space<vmem>>, %arg5: memref<2x8x9xf32, #tpu.memory_space<vmem>>, %arg6: memref<2x8x8xf32, #tpu.memory_space<vmem>>, %arg7: memref<2x8x1xf32, #tpu.memory_space<vmem>>, %arg8: memref<1x8x256xf32, #tpu.memory_space<vmem>>) attributes {dimension_semantics = [#tpu.dimension_semantics<parallel>], iteration_bounds = array<i64: 1>, scalar_prefetch = 0 : i64, scratch_operands = 0 : i64, tpu.core_type = #tpu.core_type<tc>, window_params = [{transform_indices = @transform_0, window_bounds = array<i64: 1, 8, 256>}, {pipeline_mode = #tpu.pipeline_mode<synchronous>, transform_indices = @transform_1, window_bounds = array<i64: 2, 8, 9>}, {pipeline_mode = #tpu.pipeline_mode<synchronous>, transform_indices = @transform_2, window_bounds = array<i64: 2, 8, 8>}, {pipeline_mode = #tpu.pipeline_mode<synchronous>, transform_indices = @transform_3, window_bounds = array<i64: 2, 8, 1>}, {pipeline_mode = #tpu.pipeline_mode<synchronous>, transform_indices = @transform_4, window_bounds = array<i64: 2, 8, 9>}, {pipeline_mode = #tpu.pipeline_mode<synchronous>, transform_indices = @transform_5, window_bounds = array<i64: 2, 8, 8>}, {pipeline_mode = #tpu.pipeline_mode<synchronous>, transform_indices = @transform_6, window_bounds = array<i64: 2, 8, 1>}, {transform_indices = @transform_7, window_bounds = array<i64: 1, 8, 256>}]} {
    %c0 = arith.constant 0 : index
    %c0_0 = arith.constant 0 : index
    %c0_1 = arith.constant 0 : index
    %0 = vector.load %arg1[%c0, %c0_0, %c0_1] : memref<1x8x256xf32, #tpu.memory_space<vmem>>, vector<1x8x256xf32>
    %1 = vector.shape_cast %0 : vector<1x8x256xf32> to vector<8x256xf32>
    %2 = tpu.iota {dimensions = array<i32: 1>} : vector<8x256xi32>
    %c15_i32 = arith.constant 15 : i32
    %3 = vector.broadcast %c15_i32 : i32 to vector<8x256xi32>
    %4 = arith.andi %2, %3 : vector<8x256xi32>
    %c16_i32 = arith.constant 16 : i32
    %5 = vector.broadcast %c16_i32 : i32 to vector<8x256xi32>
    %6 = arith.cmpi sge, %2, %5 : vector<8x256xi32>
    %c240_i32 = arith.constant 240 : i32
    %7 = vector.broadcast %c240_i32 : i32 to vector<8x256xi32>
    %8 = arith.cmpi slt, %2, %7 : vector<8x256xi32>
    %c1_i32 = arith.constant 1 : i32
    %9 = vector.broadcast %c1_i32 : i32 to vector<8x256xi32>
    %10 = arith.cmpi sge, %4, %9 : vector<8x256xi32>
    %c14_i32 = arith.constant 14 : i32
    %11 = vector.broadcast %c14_i32 : i32 to vector<8x256xi32>
    %12 = arith.cmpi sle, %4, %11 : vector<8x256xi32>
    %13 = arith.andi %6, %10 : vector<8x256xi1>
    %14 = arith.extui %13 : vector<8x256xi1> to vector<8x256xi32>
    %15 = arith.sitofp %14 : vector<8x256xi32> to vector<8x256xf32>
    %16 = arith.extui %6 : vector<8x256xi1> to vector<8x256xi32>
    %17 = arith.sitofp %16 : vector<8x256xi32> to vector<8x256xf32>
    %18 = arith.andi %6, %12 : vector<8x256xi1>
    %19 = arith.extui %18 : vector<8x256xi1> to vector<8x256xi32>
    %20 = arith.sitofp %19 : vector<8x256xi32> to vector<8x256xf32>
    %21 = arith.extui %10 : vector<8x256xi1> to vector<8x256xi32>
    %22 = arith.sitofp %21 : vector<8x256xi32> to vector<8x256xf32>
    %23 = arith.extui %12 : vector<8x256xi1> to vector<8x256xi32>
    %24 = arith.sitofp %23 : vector<8x256xi32> to vector<8x256xf32>
    %25 = arith.andi %8, %10 : vector<8x256xi1>
    %26 = arith.extui %25 : vector<8x256xi1> to vector<8x256xi32>
    %27 = arith.sitofp %26 : vector<8x256xi32> to vector<8x256xf32>
    %28 = arith.extui %8 : vector<8x256xi1> to vector<8x256xi32>
    %29 = arith.sitofp %28 : vector<8x256xi32> to vector<8x256xf32>
    %30 = arith.andi %8, %12 : vector<8x256xi1>
    %31 = arith.extui %30 : vector<8x256xi1> to vector<8x256xi32>
    %32 = arith.sitofp %31 : vector<8x256xi32> to vector<8x256xf32>
    %c0_2 = arith.constant 0 : index
    %c0_3 = arith.constant 0 : index
    %c0_4 = arith.constant 0 : index
    %33 = vector.load %arg2[%c0_2, %c0_3, %c0_4] : memref<2x8x9xf32, #tpu.memory_space<vmem>>, vector<1x8x9xf32>
    %34 = vector.shape_cast %33 : vector<1x8x9xf32> to vector<8x9xf32>
    %c0_5 = arith.constant 0 : index
    %c0_6 = arith.constant 0 : index
    %c0_7 = arith.constant 0 : index
    %35 = vector.load %arg3[%c0_5, %c0_6, %c0_7] : memref<2x8x8xf32, #tpu.memory_space<vmem>>, vector<1x8x8xf32>
    %36 = vector.shape_cast %35 : vector<1x8x8xf32> to vector<8x8xf32>
    %c0_8 = arith.constant 0 : index
    %c0_9 = arith.constant 0 : index
    %c0_10 = arith.constant 0 : index
    %37 = vector.load %arg4[%c0_8, %c0_9, %c0_10] : memref<2x8x1xf32, #tpu.memory_space<vmem>>, vector<1x8x1xf32>
    %38 = vector.shape_cast %37 : vector<1x8x1xf32> to vector<8x1xf32>
    %cst = arith.constant 0.000000e+00 : f32
    %39 = vector.broadcast %cst : f32 to vector<8x256xf32>
    %c17_i32 = arith.constant 17 : i32
    %40 = tpu.dynamic_rotate %1 by %c17_i32 dim 1 : vector<8x256xf32>, i32 -> vector<8x256xf32>
    %41 = arith.mulf %40, %15 : vector<8x256xf32>
    %42 = vector.extract_strided_slice %34 {offsets = [0, 0], sizes = [8, 1], strides = [1, 1]} : vector<8x9xf32> to vector<8x1xf32>
    %43 = vector.broadcast %42 : vector<8x1xf32> to vector<8x256xf32>
    %44 = arith.mulf %41, %43 : vector<8x256xf32>
    %45 = arith.addf %39, %44 : vector<8x256xf32>
    %c16_i32_11 = arith.constant 16 : i32
    %46 = tpu.dynamic_rotate %1 by %c16_i32_11 dim 1 : vector<8x256xf32>, i32 -> vector<8x256xf32>
    %47 = arith.mulf %46, %17 : vector<8x256xf32>
    %48 = vector.extract_strided_slice %34 {offsets = [0, 1], sizes = [8, 1], strides = [1, 1]} : vector<8x9xf32> to vector<8x1xf32>
    %49 = vector.broadcast %48 : vector<8x1xf32> to vector<8x256xf32>
    %50 = arith.mulf %47, %49 : vector<8x256xf32>
    %51 = arith.addf %45, %50 : vector<8x256xf32>
    %c15_i32_12 = arith.constant 15 : i32
    %52 = tpu.dynamic_rotate %1 by %c15_i32_12 dim 1 : vector<8x256xf32>, i32 -> vector<8x256xf32>
    %53 = arith.mulf %52, %20 : vector<8x256xf32>
    %54 = vector.extract_strided_slice %34 {offsets = [0, 2], sizes = [8, 1], strides = [1, 1]} : vector<8x9xf32> to vector<8x1xf32>
    %55 = vector.broadcast %54 : vector<8x1xf32> to vector<8x256xf32>
    %56 = arith.mulf %53, %55 : vector<8x256xf32>
    %57 = arith.addf %51, %56 : vector<8x256xf32>
    %c1_i32_13 = arith.constant 1 : i32
    %58 = tpu.dynamic_rotate %1 by %c1_i32_13 dim 1 : vector<8x256xf32>, i32 -> vector<8x256xf32>
    %59 = arith.mulf %58, %22 : vector<8x256xf32>
    %60 = vector.extract_strided_slice %34 {offsets = [0, 3], sizes = [8, 1], strides = [1, 1]} : vector<8x9xf32> to vector<8x1xf32>
    %61 = vector.broadcast %60 : vector<8x1xf32> to vector<8x256xf32>
    %62 = arith.mulf %59, %61 : vector<8x256xf32>
    %63 = arith.addf %57, %62 : vector<8x256xf32>
    %64 = vector.extract_strided_slice %34 {offsets = [0, 4], sizes = [8, 1], strides = [1, 1]} : vector<8x9xf32> to vector<8x1xf32>
    %65 = vector.broadcast %64 : vector<8x1xf32> to vector<8x256xf32>
    %66 = arith.mulf %1, %65 : vector<8x256xf32>
    %67 = arith.addf %63, %66 : vector<8x256xf32>
    %c255_i32 = arith.constant 255 : i32
    %68 = tpu.dynamic_rotate %1 by %c255_i32 dim 1 : vector<8x256xf32>, i32 -> vector<8x256xf32>
    %69 = arith.mulf %68, %24 : vector<8x256xf32>
    %70 = vector.extract_strided_slice %34 {offsets = [0, 5], sizes = [8, 1], strides = [1, 1]} : vector<8x9xf32> to vector<8x1xf32>
    %71 = vector.broadcast %70 : vector<8x1xf32> to vector<8x256xf32>
    %72 = arith.mulf %69, %71 : vector<8x256xf32>
    %73 = arith.addf %67, %72 : vector<8x256xf32>
    %c241_i32 = arith.constant 241 : i32
    %74 = tpu.dynamic_rotate %1 by %c241_i32 dim 1 : vector<8x256xf32>, i32 -> vector<8x256xf32>
    %75 = arith.mulf %74, %27 : vector<8x256xf32>
    %76 = vector.extract_strided_slice %34 {offsets = [0, 6], sizes = [8, 1], strides = [1, 1]} : vector<8x9xf32> to vector<8x1xf32>
    %77 = vector.broadcast %76 : vector<8x1xf32> to vector<8x256xf32>
    %78 = arith.mulf %75, %77 : vector<8x256xf32>
    %79 = arith.addf %73, %78 : vector<8x256xf32>
    %c240_i32_14 = arith.constant 240 : i32
    %80 = tpu.dynamic_rotate %1 by %c240_i32_14 dim 1 : vector<8x256xf32>, i32 -> vector<8x256xf32>
    %81 = arith.mulf %80, %29 : vector<8x256xf32>
    %82 = vector.extract_strided_slice %34 {offsets = [0, 7], sizes = [8, 1], strides = [1, 1]} : vector<8x9xf32> to vector<8x1xf32>
    %83 = vector.broadcast %82 : vector<8x1xf32> to vector<8x256xf32>
    %84 = arith.mulf %81, %83 : vector<8x256xf32>
    %85 = arith.addf %79, %84 : vector<8x256xf32>
    %c239_i32 = arith.constant 239 : i32
    %86 = tpu.dynamic_rotate %1 by %c239_i32 dim 1 : vector<8x256xf32>, i32 -> vector<8x256xf32>
    %87 = arith.mulf %86, %32 : vector<8x256xf32>
    %88 = vector.extract_strided_slice %34 {offsets = [0, 8], sizes = [8, 1], strides = [1, 1]} : vector<8x9xf32> to vector<8x1xf32>
    %89 = vector.broadcast %88 : vector<8x1xf32> to vector<8x256xf32>
    %90 = arith.mulf %87, %89 : vector<8x256xf32>
    %91 = arith.addf %85, %90 : vector<8x256xf32>
    %cst_15 = arith.constant dense<0.000000e+00> : vector<8x256xf32>
    %92 = tpu.matmul %36, %91, %cst_15 {dimension_numbers = #tpu.dot_dimension_numbers<[1], [0], [0], [1], [0, 0, 1, 1], [], []>} : vector<8x8xf32>, vector<8x256xf32>, vector<8x256xf32> -> vector<8x256xf32>
    %93 = vector.broadcast %38 : vector<8x1xf32> to vector<8x256xf32>
    %94 = arith.addf %92, %93 : vector<8x256xf32>
    %cst_16 = arith.constant 5.000000e-01 : f32
    %95 = vector.broadcast %cst_16 : f32 to vector<8x256xf32>
    %96 = arith.mulf %95, %94 : vector<8x256xf32>
    %cst_17 = arith.constant 0.707106769 : f32
    %97 = vector.broadcast %cst_17 : f32 to vector<8x256xf32>
    %98 = arith.mulf %94, %97 : vector<8x256xf32>
    %99 = math.absf %98 : vector<8x256xf32>
    %cst_18 = arith.constant 0.327591091 : f32
    %100 = vector.broadcast %cst_18 : f32 to vector<8x256xf32>
    %101 = arith.mulf %100, %99 : vector<8x256xf32>
    %cst_19 = arith.constant 1.000000e+00 : f32
    %102 = vector.broadcast %cst_19 : f32 to vector<8x256xf32>
    %103 = arith.addf %102, %101 : vector<8x256xf32>
    %104 = tpu.reciprocal %103 {approx = true} : vector<8x256xf32> -> vector<8x256xf32>
    %cst_20 = arith.constant 1.06140542 : f32
    %105 = vector.broadcast %cst_20 : f32 to vector<8x256xf32>
    %106 = arith.mulf %104, %105 : vector<8x256xf32>
    %cst_21 = arith.constant -1.45315206 : f32
    %107 = vector.broadcast %cst_21 : f32 to vector<8x256xf32>
    %108 = arith.addf %107, %106 : vector<8x256xf32>
    %109 = arith.mulf %104, %108 : vector<8x256xf32>
    %cst_22 = arith.constant 1.42141378 : f32
    %110 = vector.broadcast %cst_22 : f32 to vector<8x256xf32>
    %111 = arith.addf %110, %109 : vector<8x256xf32>
    %112 = arith.mulf %104, %111 : vector<8x256xf32>
    %cst_23 = arith.constant -0.284496725 : f32
    %113 = vector.broadcast %cst_23 : f32 to vector<8x256xf32>
    %114 = arith.addf %113, %112 : vector<8x256xf32>
    %115 = arith.mulf %104, %114 : vector<8x256xf32>
    %cst_24 = arith.constant 0.254829586 : f32
    %116 = vector.broadcast %cst_24 : f32 to vector<8x256xf32>
    %117 = arith.addf %116, %115 : vector<8x256xf32>
    %118 = arith.mulf %104, %117 : vector<8x256xf32>
    %cst_25 = arith.constant 0.000000e+00 : f32
    %119 = vector.broadcast %cst_25 : f32 to vector<8x256xf32>
    %120 = arith.subf %119, %99 : vector<8x256xf32>
    %121 = arith.mulf %120, %99 : vector<8x256xf32>
    %122 = math.exp %121 : vector<8x256xf32>
    %123 = arith.mulf %118, %122 : vector<8x256xf32>
    %cst_26 = arith.constant 1.000000e+00 : f32
    %124 = vector.broadcast %cst_26 : f32 to vector<8x256xf32>
    %125 = arith.subf %124, %123 : vector<8x256xf32>
    %cst_27 = arith.constant 0.000000e+00 : f32
    %126 = vector.broadcast %cst_27 : f32 to vector<8x256xf32>
    %127 = arith.cmpf olt, %98, %126 : vector<8x256xf32>
    %cst_28 = arith.constant 0.000000e+00 : f32
    %128 = vector.broadcast %cst_28 : f32 to vector<8x256xf32>
    %129 = arith.subf %128, %125 : vector<8x256xf32>
    %130 = arith.select %127, %129, %125 : vector<8x256xi1>, vector<8x256xf32>
    %cst_29 = arith.constant 1.000000e+00 : f32
    %131 = vector.broadcast %cst_29 : f32 to vector<8x256xf32>
    %132 = arith.addf %131, %130 : vector<8x256xf32>
    %133 = arith.mulf %96, %132 : vector<8x256xf32>
    %c0_30 = arith.constant 0 : index
    %c0_31 = arith.constant 0 : index
    %c0_32 = arith.constant 0 : index
    %134 = vector.load %arg5[%c0_30, %c0_31, %c0_32] : memref<2x8x9xf32, #tpu.memory_space<vmem>>, vector<1x8x9xf32>
    %135 = vector.shape_cast %134 : vector<1x8x9xf32> to vector<8x9xf32>
    %c0_33 = arith.constant 0 : index
    %c0_34 = arith.constant 0 : index
    %c0_35 = arith.constant 0 : index
    %136 = vector.load %arg6[%c0_33, %c0_34, %c0_35] : memref<2x8x8xf32, #tpu.memory_space<vmem>>, vector<1x8x8xf32>
    %137 = vector.shape_cast %136 : vector<1x8x8xf32> to vector<8x8xf32>
    %c0_36 = arith.constant 0 : index
    %c0_37 = arith.constant 0 : index
    %c0_38 = arith.constant 0 : index
    %138 = vector.load %arg7[%c0_36, %c0_37, %c0_38] : memref<2x8x1xf32, #tpu.memory_space<vmem>>, vector<1x8x1xf32>
    %139 = vector.shape_cast %138 : vector<1x8x1xf32> to vector<8x1xf32>
    %cst_39 = arith.constant 0.000000e+00 : f32
    %140 = vector.broadcast %cst_39 : f32 to vector<8x256xf32>
    %c17_i32_40 = arith.constant 17 : i32
    %141 = tpu.dynamic_rotate %133 by %c17_i32_40 dim 1 : vector<8x256xf32>, i32 -> vector<8x256xf32>
    %142 = arith.mulf %141, %15 : vector<8x256xf32>
    %143 = vector.extract_strided_slice %135 {offsets = [0, 0], sizes = [8, 1], strides = [1, 1]} : vector<8x9xf32> to vector<8x1xf32>
    %144 = vector.broadcast %143 : vector<8x1xf32> to vector<8x256xf32>
    %145 = arith.mulf %142, %144 : vector<8x256xf32>
    %146 = arith.addf %140, %145 : vector<8x256xf32>
    %c16_i32_41 = arith.constant 16 : i32
    %147 = tpu.dynamic_rotate %133 by %c16_i32_41 dim 1 : vector<8x256xf32>, i32 -> vector<8x256xf32>
    %148 = arith.mulf %147, %17 : vector<8x256xf32>
    %149 = vector.extract_strided_slice %135 {offsets = [0, 1], sizes = [8, 1], strides = [1, 1]} : vector<8x9xf32> to vector<8x1xf32>
    %150 = vector.broadcast %149 : vector<8x1xf32> to vector<8x256xf32>
    %151 = arith.mulf %148, %150 : vector<8x256xf32>
    %152 = arith.addf %146, %151 : vector<8x256xf32>
    %c15_i32_42 = arith.constant 15 : i32
    %153 = tpu.dynamic_rotate %133 by %c15_i32_42 dim 1 : vector<8x256xf32>, i32 -> vector<8x256xf32>
    %154 = arith.mulf %153, %20 : vector<8x256xf32>
    %155 = vector.extract_strided_slice %135 {offsets = [0, 2], sizes = [8, 1], strides = [1, 1]} : vector<8x9xf32> to vector<8x1xf32>
    %156 = vector.broadcast %155 : vector<8x1xf32> to vector<8x256xf32>
    %157 = arith.mulf %154, %156 : vector<8x256xf32>
    %158 = arith.addf %152, %157 : vector<8x256xf32>
    %c1_i32_43 = arith.constant 1 : i32
    %159 = tpu.dynamic_rotate %133 by %c1_i32_43 dim 1 : vector<8x256xf32>, i32 -> vector<8x256xf32>
    %160 = arith.mulf %159, %22 : vector<8x256xf32>
    %161 = vector.extract_strided_slice %135 {offsets = [0, 3], sizes = [8, 1], strides = [1, 1]} : vector<8x9xf32> to vector<8x1xf32>
    %162 = vector.broadcast %161 : vector<8x1xf32> to vector<8x256xf32>
    %163 = arith.mulf %160, %162 : vector<8x256xf32>
    %164 = arith.addf %158, %163 : vector<8x256xf32>
    %165 = vector.extract_strided_slice %135 {offsets = [0, 4], sizes = [8, 1], strides = [1, 1]} : vector<8x9xf32> to vector<8x1xf32>
    %166 = vector.broadcast %165 : vector<8x1xf32> to vector<8x256xf32>
    %167 = arith.mulf %133, %166 : vector<8x256xf32>
    %168 = arith.addf %164, %167 : vector<8x256xf32>
    %c255_i32_44 = arith.constant 255 : i32
    %169 = tpu.dynamic_rotate %133 by %c255_i32_44 dim 1 : vector<8x256xf32>, i32 -> vector<8x256xf32>
    %170 = arith.mulf %169, %24 : vector<8x256xf32>
    %171 = vector.extract_strided_slice %135 {offsets = [0, 5], sizes = [8, 1], strides = [1, 1]} : vector<8x9xf32> to vector<8x1xf32>
    %172 = vector.broadcast %171 : vector<8x1xf32> to vector<8x256xf32>
    %173 = arith.mulf %170, %172 : vector<8x256xf32>
    %174 = arith.addf %168, %173 : vector<8x256xf32>
    %c241_i32_45 = arith.constant 241 : i32
    %175 = tpu.dynamic_rotate %133 by %c241_i32_45 dim 1 : vector<8x256xf32>, i32 -> vector<8x256xf32>
    %176 = arith.mulf %175, %27 : vector<8x256xf32>
    %177 = vector.extract_strided_slice %135 {offsets = [0, 6], sizes = [8, 1], strides = [1, 1]} : vector<8x9xf32> to vector<8x1xf32>
    %178 = vector.broadcast %177 : vector<8x1xf32> to vector<8x256xf32>
    %179 = arith.mulf %176, %178 : vector<8x256xf32>
    %180 = arith.addf %174, %179 : vector<8x256xf32>
    %c240_i32_46 = arith.constant 240 : i32
    %181 = tpu.dynamic_rotate %133 by %c240_i32_46 dim 1 : vector<8x256xf32>, i32 -> vector<8x256xf32>
    %182 = arith.mulf %181, %29 : vector<8x256xf32>
    %183 = vector.extract_strided_slice %135 {offsets = [0, 7], sizes = [8, 1], strides = [1, 1]} : vector<8x9xf32> to vector<8x1xf32>
    %184 = vector.broadcast %183 : vector<8x1xf32> to vector<8x256xf32>
    %185 = arith.mulf %182, %184 : vector<8x256xf32>
    %186 = arith.addf %180, %185 : vector<8x256xf32>
    %c239_i32_47 = arith.constant 239 : i32
    %187 = tpu.dynamic_rotate %133 by %c239_i32_47 dim 1 : vector<8x256xf32>, i32 -> vector<8x256xf32>
    %188 = arith.mulf %187, %32 : vector<8x256xf32>
    %189 = vector.extract_strided_slice %135 {offsets = [0, 8], sizes = [8, 1], strides = [1, 1]} : vector<8x9xf32> to vector<8x1xf32>
    %190 = vector.broadcast %189 : vector<8x1xf32> to vector<8x256xf32>
    %191 = arith.mulf %188, %190 : vector<8x256xf32>
    %192 = arith.addf %186, %191 : vector<8x256xf32>
    %cst_48 = arith.constant dense<0.000000e+00> : vector<8x256xf32>
    %193 = tpu.matmul %137, %192, %cst_48 {dimension_numbers = #tpu.dot_dimension_numbers<[1], [0], [0], [1], [0, 0, 1, 1], [], []>} : vector<8x8xf32>, vector<8x256xf32>, vector<8x256xf32> -> vector<8x256xf32>
    %194 = vector.broadcast %139 : vector<8x1xf32> to vector<8x256xf32>
    %195 = arith.addf %193, %194 : vector<8x256xf32>
    %196 = arith.addf %195, %1 : vector<8x256xf32>
    %c1 = arith.constant 1 : index
    %c0_49 = arith.constant 0 : index
    %c0_50 = arith.constant 0 : index
    %197 = vector.load %arg2[%c1, %c0_49, %c0_50] : memref<2x8x9xf32, #tpu.memory_space<vmem>>, vector<1x8x9xf32>
    %198 = vector.shape_cast %197 : vector<1x8x9xf32> to vector<8x9xf32>
    %c1_51 = arith.constant 1 : index
    %c0_52 = arith.constant 0 : index
    %c0_53 = arith.constant 0 : index
    %199 = vector.load %arg3[%c1_51, %c0_52, %c0_53] : memref<2x8x8xf32, #tpu.memory_space<vmem>>, vector<1x8x8xf32>
    %200 = vector.shape_cast %199 : vector<1x8x8xf32> to vector<8x8xf32>
    %c1_54 = arith.constant 1 : index
    %c0_55 = arith.constant 0 : index
    %c0_56 = arith.constant 0 : index
    %201 = vector.load %arg4[%c1_54, %c0_55, %c0_56] : memref<2x8x1xf32, #tpu.memory_space<vmem>>, vector<1x8x1xf32>
    %202 = vector.shape_cast %201 : vector<1x8x1xf32> to vector<8x1xf32>
    %cst_57 = arith.constant 0.000000e+00 : f32
    %203 = vector.broadcast %cst_57 : f32 to vector<8x256xf32>
    %c17_i32_58 = arith.constant 17 : i32
    %204 = tpu.dynamic_rotate %196 by %c17_i32_58 dim 1 : vector<8x256xf32>, i32 -> vector<8x256xf32>
    %205 = arith.mulf %204, %15 : vector<8x256xf32>
    %206 = vector.extract_strided_slice %198 {offsets = [0, 0], sizes = [8, 1], strides = [1, 1]} : vector<8x9xf32> to vector<8x1xf32>
    %207 = vector.broadcast %206 : vector<8x1xf32> to vector<8x256xf32>
    %208 = arith.mulf %205, %207 : vector<8x256xf32>
    %209 = arith.addf %203, %208 : vector<8x256xf32>
    %c16_i32_59 = arith.constant 16 : i32
    %210 = tpu.dynamic_rotate %196 by %c16_i32_59 dim 1 : vector<8x256xf32>, i32 -> vector<8x256xf32>
    %211 = arith.mulf %210, %17 : vector<8x256xf32>
    %212 = vector.extract_strided_slice %198 {offsets = [0, 1], sizes = [8, 1], strides = [1, 1]} : vector<8x9xf32> to vector<8x1xf32>
    %213 = vector.broadcast %212 : vector<8x1xf32> to vector<8x256xf32>
    %214 = arith.mulf %211, %213 : vector<8x256xf32>
    %215 = arith.addf %209, %214 : vector<8x256xf32>
    %c15_i32_60 = arith.constant 15 : i32
    %216 = tpu.dynamic_rotate %196 by %c15_i32_60 dim 1 : vector<8x256xf32>, i32 -> vector<8x256xf32>
    %217 = arith.mulf %216, %20 : vector<8x256xf32>
    %218 = vector.extract_strided_slice %198 {offsets = [0, 2], sizes = [8, 1], strides = [1, 1]} : vector<8x9xf32> to vector<8x1xf32>
    %219 = vector.broadcast %218 : vector<8x1xf32> to vector<8x256xf32>
    %220 = arith.mulf %217, %219 : vector<8x256xf32>
    %221 = arith.addf %215, %220 : vector<8x256xf32>
    %c1_i32_61 = arith.constant 1 : i32
    %222 = tpu.dynamic_rotate %196 by %c1_i32_61 dim 1 : vector<8x256xf32>, i32 -> vector<8x256xf32>
    %223 = arith.mulf %222, %22 : vector<8x256xf32>
    %224 = vector.extract_strided_slice %198 {offsets = [0, 3], sizes = [8, 1], strides = [1, 1]} : vector<8x9xf32> to vector<8x1xf32>
    %225 = vector.broadcast %224 : vector<8x1xf32> to vector<8x256xf32>
    %226 = arith.mulf %223, %225 : vector<8x256xf32>
    %227 = arith.addf %221, %226 : vector<8x256xf32>
    %228 = vector.extract_strided_slice %198 {offsets = [0, 4], sizes = [8, 1], strides = [1, 1]} : vector<8x9xf32> to vector<8x1xf32>
    %229 = vector.broadcast %228 : vector<8x1xf32> to vector<8x256xf32>
    %230 = arith.mulf %196, %229 : vector<8x256xf32>
    %231 = arith.addf %227, %230 : vector<8x256xf32>
    %c255_i32_62 = arith.constant 255 : i32
    %232 = tpu.dynamic_rotate %196 by %c255_i32_62 dim 1 : vector<8x256xf32>, i32 -> vector<8x256xf32>
    %233 = arith.mulf %232, %24 : vector<8x256xf32>
    %234 = vector.extract_strided_slice %198 {offsets = [0, 5], sizes = [8, 1], strides = [1, 1]} : vector<8x9xf32> to vector<8x1xf32>
    %235 = vector.broadcast %234 : vector<8x1xf32> to vector<8x256xf32>
    %236 = arith.mulf %233, %235 : vector<8x256xf32>
    %237 = arith.addf %231, %236 : vector<8x256xf32>
    %c241_i32_63 = arith.constant 241 : i32
    %238 = tpu.dynamic_rotate %196 by %c241_i32_63 dim 1 : vector<8x256xf32>, i32 -> vector<8x256xf32>
    %239 = arith.mulf %238, %27 : vector<8x256xf32>
    %240 = vector.extract_strided_slice %198 {offsets = [0, 6], sizes = [8, 1], strides = [1, 1]} : vector<8x9xf32> to vector<8x1xf32>
    %241 = vector.broadcast %240 : vector<8x1xf32> to vector<8x256xf32>
    %242 = arith.mulf %239, %241 : vector<8x256xf32>
    %243 = arith.addf %237, %242 : vector<8x256xf32>
    %c240_i32_64 = arith.constant 240 : i32
    %244 = tpu.dynamic_rotate %196 by %c240_i32_64 dim 1 : vector<8x256xf32>, i32 -> vector<8x256xf32>
    %245 = arith.mulf %244, %29 : vector<8x256xf32>
    %246 = vector.extract_strided_slice %198 {offsets = [0, 7], sizes = [8, 1], strides = [1, 1]} : vector<8x9xf32> to vector<8x1xf32>
    %247 = vector.broadcast %246 : vector<8x1xf32> to vector<8x256xf32>
    %248 = arith.mulf %245, %247 : vector<8x256xf32>
    %249 = arith.addf %243, %248 : vector<8x256xf32>
    %c239_i32_65 = arith.constant 239 : i32
    %250 = tpu.dynamic_rotate %196 by %c239_i32_65 dim 1 : vector<8x256xf32>, i32 -> vector<8x256xf32>
    %251 = arith.mulf %250, %32 : vector<8x256xf32>
    %252 = vector.extract_strided_slice %198 {offsets = [0, 8], sizes = [8, 1], strides = [1, 1]} : vector<8x9xf32> to vector<8x1xf32>
    %253 = vector.broadcast %252 : vector<8x1xf32> to vector<8x256xf32>
    %254 = arith.mulf %251, %253 : vector<8x256xf32>
    %255 = arith.addf %249, %254 : vector<8x256xf32>
    %cst_66 = arith.constant dense<0.000000e+00> : vector<8x256xf32>
    %256 = tpu.matmul %200, %255, %cst_66 {dimension_numbers = #tpu.dot_dimension_numbers<[1], [0], [0], [1], [0, 0, 1, 1], [], []>} : vector<8x8xf32>, vector<8x256xf32>, vector<8x256xf32> -> vector<8x256xf32>
    %257 = vector.broadcast %202 : vector<8x1xf32> to vector<8x256xf32>
    %258 = arith.addf %256, %257 : vector<8x256xf32>
    %cst_67 = arith.constant 5.000000e-01 : f32
    %259 = vector.broadcast %cst_67 : f32 to vector<8x256xf32>
    %260 = arith.mulf %259, %258 : vector<8x256xf32>
    %cst_68 = arith.constant 0.707106769 : f32
    %261 = vector.broadcast %cst_68 : f32 to vector<8x256xf32>
    %262 = arith.mulf %258, %261 : vector<8x256xf32>
    %263 = math.absf %262 : vector<8x256xf32>
    %cst_69 = arith.constant 0.327591091 : f32
    %264 = vector.broadcast %cst_69 : f32 to vector<8x256xf32>
    %265 = arith.mulf %264, %263 : vector<8x256xf32>
    %cst_70 = arith.constant 1.000000e+00 : f32
    %266 = vector.broadcast %cst_70 : f32 to vector<8x256xf32>
    %267 = arith.addf %266, %265 : vector<8x256xf32>
    %268 = tpu.reciprocal %267 {approx = true} : vector<8x256xf32> -> vector<8x256xf32>
    %cst_71 = arith.constant 1.06140542 : f32
    %269 = vector.broadcast %cst_71 : f32 to vector<8x256xf32>
    %270 = arith.mulf %268, %269 : vector<8x256xf32>
    %cst_72 = arith.constant -1.45315206 : f32
    %271 = vector.broadcast %cst_72 : f32 to vector<8x256xf32>
    %272 = arith.addf %271, %270 : vector<8x256xf32>
    %273 = arith.mulf %268, %272 : vector<8x256xf32>
    %cst_73 = arith.constant 1.42141378 : f32
    %274 = vector.broadcast %cst_73 : f32 to vector<8x256xf32>
    %275 = arith.addf %274, %273 : vector<8x256xf32>
    %276 = arith.mulf %268, %275 : vector<8x256xf32>
    %cst_74 = arith.constant -0.284496725 : f32
    %277 = vector.broadcast %cst_74 : f32 to vector<8x256xf32>
    %278 = arith.addf %277, %276 : vector<8x256xf32>
    %279 = arith.mulf %268, %278 : vector<8x256xf32>
    %cst_75 = arith.constant 0.254829586 : f32
    %280 = vector.broadcast %cst_75 : f32 to vector<8x256xf32>
    %281 = arith.addf %280, %279 : vector<8x256xf32>
    %282 = arith.mulf %268, %281 : vector<8x256xf32>
    %cst_76 = arith.constant 0.000000e+00 : f32
    %283 = vector.broadcast %cst_76 : f32 to vector<8x256xf32>
    %284 = arith.subf %283, %263 : vector<8x256xf32>
    %285 = arith.mulf %284, %263 : vector<8x256xf32>
    %286 = math.exp %285 : vector<8x256xf32>
    %287 = arith.mulf %282, %286 : vector<8x256xf32>
    %cst_77 = arith.constant 1.000000e+00 : f32
    %288 = vector.broadcast %cst_77 : f32 to vector<8x256xf32>
    %289 = arith.subf %288, %287 : vector<8x256xf32>
    %cst_78 = arith.constant 0.000000e+00 : f32
    %290 = vector.broadcast %cst_78 : f32 to vector<8x256xf32>
    %291 = arith.cmpf olt, %262, %290 : vector<8x256xf32>
    %cst_79 = arith.constant 0.000000e+00 : f32
    %292 = vector.broadcast %cst_79 : f32 to vector<8x256xf32>
    %293 = arith.subf %292, %289 : vector<8x256xf32>
    %294 = arith.select %291, %293, %289 : vector<8x256xi1>, vector<8x256xf32>
    %cst_80 = arith.constant 1.000000e+00 : f32
    %295 = vector.broadcast %cst_80 : f32 to vector<8x256xf32>
    %296 = arith.addf %295, %294 : vector<8x256xf32>
    %297 = arith.mulf %260, %296 : vector<8x256xf32>
    %c1_81 = arith.constant 1 : index
    %c0_82 = arith.constant 0 : index
    %c0_83 = arith.constant 0 : index
    %298 = vector.load %arg5[%c1_81, %c0_82, %c0_83] : memref<2x8x9xf32, #tpu.memory_space<vmem>>, vector<1x8x9xf32>
    %299 = vector.shape_cast %298 : vector<1x8x9xf32> to vector<8x9xf32>
    %c1_84 = arith.constant 1 : index
    %c0_85 = arith.constant 0 : index
    %c0_86 = arith.constant 0 : index
    %300 = vector.load %arg6[%c1_84, %c0_85, %c0_86] : memref<2x8x8xf32, #tpu.memory_space<vmem>>, vector<1x8x8xf32>
    %301 = vector.shape_cast %300 : vector<1x8x8xf32> to vector<8x8xf32>
    %c1_87 = arith.constant 1 : index
    %c0_88 = arith.constant 0 : index
    %c0_89 = arith.constant 0 : index
    %302 = vector.load %arg7[%c1_87, %c0_88, %c0_89] : memref<2x8x1xf32, #tpu.memory_space<vmem>>, vector<1x8x1xf32>
    %303 = vector.shape_cast %302 : vector<1x8x1xf32> to vector<8x1xf32>
    %cst_90 = arith.constant 0.000000e+00 : f32
    %304 = vector.broadcast %cst_90 : f32 to vector<8x256xf32>
    %c17_i32_91 = arith.constant 17 : i32
    %305 = tpu.dynamic_rotate %297 by %c17_i32_91 dim 1 : vector<8x256xf32>, i32 -> vector<8x256xf32>
    %306 = arith.mulf %305, %15 : vector<8x256xf32>
    %307 = vector.extract_strided_slice %299 {offsets = [0, 0], sizes = [8, 1], strides = [1, 1]} : vector<8x9xf32> to vector<8x1xf32>
    %308 = vector.broadcast %307 : vector<8x1xf32> to vector<8x256xf32>
    %309 = arith.mulf %306, %308 : vector<8x256xf32>
    %310 = arith.addf %304, %309 : vector<8x256xf32>
    %c16_i32_92 = arith.constant 16 : i32
    %311 = tpu.dynamic_rotate %297 by %c16_i32_92 dim 1 : vector<8x256xf32>, i32 -> vector<8x256xf32>
    %312 = arith.mulf %311, %17 : vector<8x256xf32>
    %313 = vector.extract_strided_slice %299 {offsets = [0, 1], sizes = [8, 1], strides = [1, 1]} : vector<8x9xf32> to vector<8x1xf32>
    %314 = vector.broadcast %313 : vector<8x1xf32> to vector<8x256xf32>
    %315 = arith.mulf %312, %314 : vector<8x256xf32>
    %316 = arith.addf %310, %315 : vector<8x256xf32>
    %c15_i32_93 = arith.constant 15 : i32
    %317 = tpu.dynamic_rotate %297 by %c15_i32_93 dim 1 : vector<8x256xf32>, i32 -> vector<8x256xf32>
    %318 = arith.mulf %317, %20 : vector<8x256xf32>
    %319 = vector.extract_strided_slice %299 {offsets = [0, 2], sizes = [8, 1], strides = [1, 1]} : vector<8x9xf32> to vector<8x1xf32>
    %320 = vector.broadcast %319 : vector<8x1xf32> to vector<8x256xf32>
    %321 = arith.mulf %318, %320 : vector<8x256xf32>
    %322 = arith.addf %316, %321 : vector<8x256xf32>
    %c1_i32_94 = arith.constant 1 : i32
    %323 = tpu.dynamic_rotate %297 by %c1_i32_94 dim 1 : vector<8x256xf32>, i32 -> vector<8x256xf32>
    %324 = arith.mulf %323, %22 : vector<8x256xf32>
    %325 = vector.extract_strided_slice %299 {offsets = [0, 3], sizes = [8, 1], strides = [1, 1]} : vector<8x9xf32> to vector<8x1xf32>
    %326 = vector.broadcast %325 : vector<8x1xf32> to vector<8x256xf32>
    %327 = arith.mulf %324, %326 : vector<8x256xf32>
    %328 = arith.addf %322, %327 : vector<8x256xf32>
    %329 = vector.extract_strided_slice %299 {offsets = [0, 4], sizes = [8, 1], strides = [1, 1]} : vector<8x9xf32> to vector<8x1xf32>
    %330 = vector.broadcast %329 : vector<8x1xf32> to vector<8x256xf32>
    %331 = arith.mulf %297, %330 : vector<8x256xf32>
    %332 = arith.addf %328, %331 : vector<8x256xf32>
    %c255_i32_95 = arith.constant 255 : i32
    %333 = tpu.dynamic_rotate %297 by %c255_i32_95 dim 1 : vector<8x256xf32>, i32 -> vector<8x256xf32>
    %334 = arith.mulf %333, %24 : vector<8x256xf32>
    %335 = vector.extract_strided_slice %299 {offsets = [0, 5], sizes = [8, 1], strides = [1, 1]} : vector<8x9xf32> to vector<8x1xf32>
    %336 = vector.broadcast %335 : vector<8x1xf32> to vector<8x256xf32>
    %337 = arith.mulf %334, %336 : vector<8x256xf32>
    %338 = arith.addf %332, %337 : vector<8x256xf32>
    %c241_i32_96 = arith.constant 241 : i32
    %339 = tpu.dynamic_rotate %297 by %c241_i32_96 dim 1 : vector<8x256xf32>, i32 -> vector<8x256xf32>
    %340 = arith.mulf %339, %27 : vector<8x256xf32>
    %341 = vector.extract_strided_slice %299 {offsets = [0, 6], sizes = [8, 1], strides = [1, 1]} : vector<8x9xf32> to vector<8x1xf32>
    %342 = vector.broadcast %341 : vector<8x1xf32> to vector<8x256xf32>
    %343 = arith.mulf %340, %342 : vector<8x256xf32>
    %344 = arith.addf %338, %343 : vector<8x256xf32>
    %c240_i32_97 = arith.constant 240 : i32
    %345 = tpu.dynamic_rotate %297 by %c240_i32_97 dim 1 : vector<8x256xf32>, i32 -> vector<8x256xf32>
    %346 = arith.mulf %345, %29 : vector<8x256xf32>
    %347 = vector.extract_strided_slice %299 {offsets = [0, 7], sizes = [8, 1], strides = [1, 1]} : vector<8x9xf32> to vector<8x1xf32>
    %348 = vector.broadcast %347 : vector<8x1xf32> to vector<8x256xf32>
    %349 = arith.mulf %346, %348 : vector<8x256xf32>
    %350 = arith.addf %344, %349 : vector<8x256xf32>
    %c239_i32_98 = arith.constant 239 : i32
    %351 = tpu.dynamic_rotate %297 by %c239_i32_98 dim 1 : vector<8x256xf32>, i32 -> vector<8x256xf32>
    %352 = arith.mulf %351, %32 : vector<8x256xf32>
    %353 = vector.extract_strided_slice %299 {offsets = [0, 8], sizes = [8, 1], strides = [1, 1]} : vector<8x9xf32> to vector<8x1xf32>
    %354 = vector.broadcast %353 : vector<8x1xf32> to vector<8x256xf32>
    %355 = arith.mulf %352, %354 : vector<8x256xf32>
    %356 = arith.addf %350, %355 : vector<8x256xf32>
    %cst_99 = arith.constant dense<0.000000e+00> : vector<8x256xf32>
    %357 = tpu.matmul %301, %356, %cst_99 {dimension_numbers = #tpu.dot_dimension_numbers<[1], [0], [0], [1], [0, 0, 1, 1], [], []>} : vector<8x8xf32>, vector<8x256xf32>, vector<8x256xf32> -> vector<8x256xf32>
    %358 = vector.broadcast %303 : vector<8x1xf32> to vector<8x256xf32>
    %359 = arith.addf %357, %358 : vector<8x256xf32>
    %360 = arith.addf %359, %196 : vector<8x256xf32>
    %c0_100 = arith.constant 0 : index
    %c0_101 = arith.constant 0 : index
    %c0_102 = arith.constant 0 : index
    %361 = vector.load %arg8[%c0_100, %c0_101, %c0_102] : memref<1x8x256xf32, #tpu.memory_space<vmem>>, vector<1x8x256xf32>
    %362 = vector.shape_cast %361 : vector<1x8x256xf32> to vector<8x256xf32>
    %363 = vector.shape_cast %360 : vector<8x256xf32> to vector<1x8x256xf32>
    tpu.vector_store %arg8[%c0_100, %c0_101, %c0_102], %363 {strides = array<i32>} : memref<1x8x256xf32, #tpu.memory_space<vmem>>, vector<1x8x256xf32>,
    return
  }
  func.func @transform_0(%arg0: i32) -> (i32, i32, i32) {
    %c0_i32 = arith.constant 0 : i32
    %c0_i32_0 = arith.constant 0 : i32
    %c0_i32_1 = arith.constant 0 : i32
    return %arg0, %c0_i32, %c0_i32_0 : i32, i32, i32
  }
  func.func @transform_1(%arg0: i32) -> (i32, i32, i32) {
    %c0_i32 = arith.constant 0 : i32
    %c0_i32_0 = arith.constant 0 : i32
    %c0_i32_1 = arith.constant 0 : i32
    %c0_i32_2 = arith.constant 0 : i32
    return %c0_i32, %c0_i32_0, %c0_i32_1 : i32, i32, i32
  }
  func.func @transform_2(%arg0: i32) -> (i32, i32, i32) {
    %c0_i32 = arith.constant 0 : i32
    %c0_i32_0 = arith.constant 0 : i32
    %c0_i32_1 = arith.constant 0 : i32
    %c0_i32_2 = arith.constant 0 : i32
    return %c0_i32, %c0_i32_0, %c0_i32_1 : i32, i32, i32
  }
  func.func @transform_3(%arg0: i32) -> (i32, i32, i32) {
    %c0_i32 = arith.constant 0 : i32
    %c0_i32_0 = arith.constant 0 : i32
    %c0_i32_1 = arith.constant 0 : i32
    %c0_i32_2 = arith.constant 0 : i32
    return %c0_i32, %c0_i32_0, %c0_i32_1 : i32, i32, i32
  }
  func.func @transform_4(%arg0: i32) -> (i32, i32, i32) {
    %c0_i32 = arith.constant 0 : i32
    %c0_i32_0 = arith.constant 0 : i32
    %c0_i32_1 = arith.constant 0 : i32
    %c0_i32_2 = arith.constant 0 : i32
    return %c0_i32, %c0_i32_0, %c0_i32_1 : i32, i32, i32
  }
  func.func @transform_5(%arg0: i32) -> (i32, i32, i32) {
    %c0_i32 = arith.constant 0 : i32
    %c0_i32_0 = arith.constant 0 : i32
    %c0_i32_1 = arith.constant 0 : i32
    %c0_i32_2 = arith.constant 0 : i32
    return %c0_i32, %c0_i32_0, %c0_i32_1 : i32, i32, i32
  }
  func.func @transform_6(%arg0: i32) -> (i32, i32, i32) {
    %c0_i32 = arith.constant 0 : i32
    %c0_i32_0 = arith.constant 0 : i32
    %c0_i32_1 = arith.constant 0 : i32
    %c0_i32_2 = arith.constant 0 : i32
    return %c0_i32, %c0_i32_0, %c0_i32_1 : i32, i32, i32
  }
  func.func @transform_7(%arg0: i32) -> (i32, i32, i32) {
    %c0_i32 = arith.constant 0 : i32
    %c0_i32_0 = arith.constant 0 : i32
    %c0_i32_1 = arith.constant 0 : i32
    return %arg0, %c0_i32, %c0_i32_0 : i32, i32, i32
  }
}

</mosaic_0001>

<bundles_post_ra>
// kernel: dblock_forward.1
= control target key start
LH: loop header
LB: loop body
LE: loop exit
PB: predicated region body
PF: predicated region fallthrough
CT: control target
= control target key end

     0   :  { %v1063_v1 = vmov 3   ;;  %v1064_v2 = vmov 1   ;;  %s1065_s26 = smov 16   ;;  %s1066_s27 = smov 17   ;;  %v1068_v3 = vmov 2   ;;  %v1070_v6 = vmov 0   ;;  %s1732_s0 = inlined_call_operand.vmem [shape: f32[1,8,256], index: 0, kind: input, shape index: {}]   ;;  %s1733_s1 = inlined_call_operand.vmem [shape: f32[2,8,9], index: 1, kind: input, shape index: {}]   ;;  %s1734_s3 = inlined_call_operand.vmem [shape: f32[2,8,1], index: 3, kind: input, shape index: {}]   ;;  %s1735_s4 = inlined_call_operand.vmem [shape: f32[2,8,9], index: 4, kind: input, shape index: {}]   ;;  %s1736_s2 = inlined_call_operand.vmem [shape: f32[2,8,8], index: 2, kind: input, shape index: {}]   ;;  %s1737_s6 = inlined_call_operand.vmem [shape: f32[2,8,1], index: 6, kind: input, shape index: {}]   ;;  %s1738_s5 = inlined_call_operand.vmem [shape: f32[2,8,8], index: 5, kind: input, shape index: {}]   ;;  %s1739_s7 = inlined_call_operand.vmem [shape: f32[1,8,256], index: 7, kind: output, shape index: {}]  }
   0x1   :  { %v1124_v0 = vld [vmem:[%s1732_s0] sm:$0xff]  ;;  %1010 = vset.pattern.permute.xlu0 %v1063_v1  ;;  %1008 = vset.pattern.permute.xlu1 %v1064_v2  ;;  %s1067_s28 = smov 15   ;;  %v1138_v4 = vld [vmem:[%s1732_s0 + $0x8] sm:$0xff]  ;;  %s1069_s10 = smov 1   ;;  %v1071_v7 = vmov 4   ;;  %v1074_v8 = vmov 8   ;;  %v28_v24 = vlaneseq }
   0x2   :  { %102 = vrot.lane.b32.xlu1 %v1124_v0, %s1065_s26  ;;  %84 = vrot.lane.b32.xlu0 %v1124_v0, %s1066_s27  ;;  %v81_v5 = vld [vmem:[%s1733_s1] sm:$0xff]  ;;  %s1072_s0 = smov 127   ;;  %s1073_s11 = smov 113   ;;  %v1076_v9 = vmov 5   ;;  %v1078_v11 = vmov 6   ;;  %v1079_v12 = vmov 7  }
   0x3   :  { %119 = vrot.lane.b32.xlu2 %v1124_v0, %s1067_s28  ;;  %s1075_s12 = smov 112   ;;  %s1077_s13 = smov 111   ;;  %v83_v10 = vld [vmem:[%s1734_s3] sm:$0xff]  ;;  %v1187_v26 = vand.u32 127, %v28_v24  ;;  %v1080_v39 = vmov 0.0  }
   0x4   :  { %1009 = vset.pattern.permute.xlu2 %v1068_v3  ;;  %v1225_v38 = vld [vmem:[%s1735_s4] sm:$0xff] }
   0x5   :  { %v1192_v29 = vadd.s32 128, %v1187_v26  ;;  %v31_v30 = vand.u32 15, %v1187_v26  ;;  %vm33_vm1 = vcmp.ge.s32.totalorder %v1187_v26, 16  ;;  %vm88_vm5 = vcmp.lt.s32.totalorder %v1187_v26, 17 }
   0x6   :  { %vm123_vm6 = vcmp.lt.s32.totalorder %v1187_v26, 15  ;;  %vm106_vm7 = vcmp.lt.s32.totalorder %v1187_v26, 16  ;;  %v1253_v45 = vsel %vm33_vm1, 1.0, %v1080_v39  ;;  %vm140_vm10 = vcmp.lt.s32.totalorder %v1187_v26, 1 }
   0x7   :  { %vm1197_vm0 = vcmp.ge.s32.totalorder %v31_v30, 1  ;;  %v32_v33 = vand.u32 15, %v1192_v29  ;;  %vm1205_vm2 = vcmp.le.s32.totalorder %v31_v30, 14  ;;  %vm36_vm11 = vcmp.lt.s32.totalorder %v1192_v29, 240 }
   0x8   :  { %vm41_vm4 = vmand %vm33_vm1, %vm1197_vm0  ;;  %v1282_v63 = vsel %vm1197_vm0, 1.0, %v1080_v39  ;;  %vm165_vm12 = vcmp.lt.s32.totalorder %v1187_v26, 127  ;;  %vm182_vm14 = vcmp.lt.s32.totalorder %v1187_v26, 113  ;;  %vm199_vm15 = vcmp.lt.s32.totalorder %v1187_v26, 112 }
   0x9   :  { %vm1209_vm3 = vcmp.ge.s32.totalorder %v32_v33, 1  ;;  %vm51_vm8 = vmand %vm33_vm1, %vm1205_vm2  ;;  %v1232_v40 = vsel %vm41_vm4, 1.0, %v1080_v39  ;;  %vm1245_vm9 = vcmp.le.s32.totalorder %v32_v33, 14  ;;  %vm216_vm0 = vcmp.lt.s32.totalorder %v1187_v26, 111 }
   0xa   :  { %104 = vrot.lane.b32.xlu1 %v1138_v4, %s1065_s26  ;;  %86 = vrot.lane.b32.xlu0 %v1138_v4, %s1066_s27  ;;  %v1237_v41 = vsel %vm1209_vm3, 1.0, %v1080_v39  ;;  %v1258_v47 = vsel %vm51_vm8, 1.0, %v1080_v39  ;;  %v1269_v52 = vsel %vm1245_vm9, 1.0, %v1080_v39  ;;  %vm66_vm13 = vmand %vm36_vm11, %vm1209_vm3 }
   0xb   :  { %121 = vrot.lane.b32.xlu2 %v1138_v4, %s1067_s28  ;;  %v1317_v32 = vsel %vm66_vm13, 1.0, %v1080_v39  ;;  %vm76_vm1 = vmand %vm36_vm11, %vm1245_vm9 }
  0x12   :  { %112 = vperm.xlu1 %1008, %v81_v5   ;;  %146 = vperm.xlu0 %1010, %v81_v5  }
  0x13   :  { %136 = vrot.lane.b32.xlu2 %v1124_v0, %s1069_s10 }
  0x1a   :  { %138 = vrot.lane.b32.xlu1 %v1138_v4, %s1069_s10  ;;  %1011 = vset.pattern.permute.xlu0 %v1070_v6 }
  0x1b   :  { %95 = vperm.xlu0 %1011, %v81_v5   ;;  %129 = vperm.xlu2 %1009, %v81_v5  }
  0x1c   :  { %1012 = vset.pattern.permute.xlu1 %v1071_v7 }
  0x22   :  { %161 = vrot.lane.b32.xlu1 %v1124_v0, %s1072_s0 }
  0x23   :  { %180 = vrot.lane.b32.xlu0 %v1138_v4, %s1073_s11  ;;  %163 = vrot.lane.b32.xlu2 %v1138_v4, %s1072_s0 }
  0x24   :  { %1016 = vset.pattern.permute.xlu2 %v1074_v8 }
  0x2a   :  { %154 = vperm.xlu1 %1012, %v81_v5  }
  0x2b   :  { %197 = vrot.lane.b32.xlu0 %v1138_v4, %s1075_s12  ;;  %178 = vrot.lane.b32.xlu2 %v1124_v0, %s1073_s11 }
  0x32   :  { %1013 = vset.pattern.permute.xlu1 %v1076_v9 }
  0x33   :  { %171 = vperm.xlu1 %1013, %v81_v5   ;;  %214 = vrot.lane.b32.xlu0 %v1138_v4, %s1077_s13 }
  0x34   :  { %195 = vrot.lane.b32.xlu2 %v1124_v0, %s1075_s12 }
  0x3b   :  { %1014 = vset.pattern.permute.xlu1 %v1078_v11  ;;  %231 = vperm.xlu0 %1011, %v83_v10  }
  0x3c   :  { %188 = vperm.xlu1 %1014, %v81_v5   ;;  %212 = vrot.lane.b32.xlu2 %v1124_v0, %s1077_s13 }
  0x43   :  { %1018 = vset.pattern.permute.xlu0 %v1064_v2 }
  0x44   :  { %1015 = vset.pattern.permute.xlu1 %v1079_v12  ;;  %222 = vperm.xlu2 %1016, %v81_v5  }
  0x45   :  { %205 = vperm.xlu1 %1015, %v81_v5   ;;  %359 = vperm.xlu0 %1018, %v1225_v38  }
  0x4c   :  { %1017 = vset.pattern.permute.xlu2 %v1070_v6 }
  0x4d   :  { %1019 = vset.pattern.permute.xlu1 %v1068_v3  ;;  %343 = vperm.xlu2 %1017, %v1225_v38  }
  0x4e   :  { %375 = vperm.xlu1 %1019, %v1225_v38   ;;  %1025 = vset.pattern.permute.xlu0 %v1074_v8 }
  0x55   :  { %1020 = vset.pattern.permute.xlu2 %v1063_v1 }
  0x56   :  { %1026 = vset.pattern.permute.xlu1 %v1070_v6  ;;  %391 = vperm.xlu2 %1020, %v1225_v38  }
  0x5d   :  { %v120_v13 = vpop.permute.xlu2 %119 }
  0x5e   :  { %1021 = vset.pattern.permute.xlu2 %v1071_v7 }
  0x5f   :  { %399 = vperm.xlu2 %1021, %v1225_v38  }
  0x65   :  { %v122_v14 = vpop.permute.xlu2 %121 }
  0x66   :  { %v125_v48 = vsel %vm123_vm6, %v122_v14, %v120_v13  ;;  %v124_v53 = vsel %vm123_vm6, %v120_v13, %v122_v14 }
  0x67   :  { %v126_v58 = vmul.f32 %v1258_v47, %v125_v48  ;;  %v127_v60 = vmul.f32 %v1269_v52, %v124_v53  ;;  %1022 = vset.pattern.permute.xlu2 %v1076_v9 }
  0x68   :  { %415 = vperm.xlu2 %1022, %v1225_v38  }
  0x6d   :  { %v137_v18 = vpop.permute.xlu2 %136 }
  0x70   :  { %1023 = vset.pattern.permute.xlu2 %v1078_v11 }
  0x74   :  { %v103_v15 = vpop.permute.xlu1 %102  ;;  %v85_v16 = vpop.permute.xlu0 %84 }
  0x75   :  { %v1181_v21 = vpop.permute.xlu2 %129 }
  0x7c   :  { %v105_v17 = vpop.permute.xlu1 %104  ;;  %v87_v19 = vpop.permute.xlu0 %86 }
  0x7d   :  { %v1185_v25 = vpop.permute.xlu2 %163  ;;  %v89_v42 = vsel %vm88_vm5, %v85_v16, %v87_v19  ;;  %v90_v43 = vsel %vm88_vm5, %v87_v19, %v85_v16  ;;  %v108_v46 = vsel %vm106_vm7, %v105_v17, %v103_v15  ;;  %v107_v59 = vsel %vm106_vm7, %v103_v15, %v105_v17 }
  0x7e   :  { %v91_v49 = vmul.f32 %v1232_v40, %v90_v43  ;;  %v92_v50 = vmul.f32 %v1237_v41, %v89_v42  ;;  %v109_v54 = vmul.f32 %v1253_v45, %v108_v46  ;;  %v132_v16 = vmul.f32 %v1181_v21, %v126_v58 }
  0x7f   :  { %v133_v17 = vmul.f32 %v1181_v21, %v127_v60 }
  0x84   :  { %v113_v20 = vpop.permute.xlu1 %112  ;;  %v1183_v22 = vpop.permute.xlu0 %146 }
  0x85   :  { %v1195_v31 = vpop.permute.xlu2 %178  ;;  %v115_v61 = vmul.f32 %v113_v20, %v109_v54  ;;  %v116_v62 = vmul.f32 %v113_v20, %v107_v59  ;;  %v1306_v20 = vsel %vm1205_vm2, 1.0, %v1080_v39  ;;  %vm234_vm2 = vcmask 64512  }
  0x8c   :  { %v139_v23 = vpop.permute.xlu1 %138 }
  0x8d   :  { %v96_v27 = vpop.permute.xlu0 %95  ;;  %v141_v5 = vsel %vm140_vm10, %v137_v18, %v139_v23  ;;  %v142_v10 = vsel %vm140_vm10, %v139_v23, %v137_v18 }
  0x8e   :  { %v1264_v51 = vpop.permute.xlu2 %195  ;;  %v98_v55 = vmul.f32 %v96_v27, %v91_v49  ;;  %v99_v56 = vmul.f32 %v96_v27, %v92_v50  ;;  %v143_v18 = vmul.f32 %v1282_v63, %v142_v10  ;;  %v144_v19 = vmul.f32 %v1237_v41, %v141_v5 }
  0x8f   :  { %v1345_v49 = vsel %vm36_vm11, 1.0, %v1080_v39 }
  0x90   :  { %v117_v14 = vadd.f32 %v115_v61, %v98_v55  ;;  %v118_v15 = vadd.f32 %v116_v62, %v99_v56  ;;  %v149_v36 = vmul.f32 %v1183_v22, %v143_v18  ;;  %v150_v42 = vmul.f32 %v1183_v22, %v144_v19 }
  0x91   :  { %v1354_v55 = vsel %vm76_vm1, 1.0, %v1080_v39 }
  0x92   :  { %v134_v23 = vadd.f32 %v132_v16, %v117_v14  ;;  %v135_v24 = vadd.f32 %v133_v17, %v118_v15 }
  0x94   :  { %v1189_v28 = vpop.permute.xlu1 %161 }
  0x95   :  { %v1218_v37 = vpop.permute.xlu0 %180  ;;  %v166_v21 = vsel %vm165_vm12, %v1189_v28, %v1185_v25  ;;  %v167_v27 = vsel %vm165_vm12, %v1185_v25, %v1189_v28 }
  0x96   :  { %v213_v30 = vpop.permute.xlu2 %212  ;;  %v183_v33 = vsel %vm182_vm14, %v1195_v31, %v1218_v37  ;;  %v184_v25 = vsel %vm182_vm14, %v1218_v37, %v1195_v31  ;;  %v168_v28 = vmul.f32 %v1306_v20, %v166_v21  ;;  %v169_v43 = vmul.f32 %v1269_v52, %v167_v27 }
  0x97   :  { %v185_v22 = vmul.f32 %v1282_v63, %v183_v33  ;;  %v151_v31 = vadd.f32 %v149_v36, %v134_v23  ;;  %v152_v37 = vadd.f32 %v150_v42, %v135_v24  ;;  %v186_v50 = vmul.f32 %v1317_v32, %v184_v25 }
  0x9c   :  { %v1203_v34 = vpop.permute.xlu1 %154 }
  0x9d   :  { %v198_v13 = vpop.permute.xlu0 %197  ;;  %v157_v46 = vmul.f32 %v1203_v34, %v1124_v0  ;;  %v158_v48 = vmul.f32 %v1203_v34, %v1138_v4 }
  0x9e   :  { %v201_v34 = vsel %vm199_vm15, %v198_v13, %v1264_v51  ;;  %v200_v39 = vsel %vm199_vm15, %v1264_v51, %v198_v13  ;;  %v223_v15 = vpop.permute.xlu2 %222  ;;  %v82_v51 = vld [vmem:[%s1736_s2] sm:$0xff] }
  0x9f   :  { %v159_v58 = vadd.f32 %v157_v46, %v151_v31  ;;  %v160_v59 = vadd.f32 %v158_v48, %v152_v37  ;;  %v203_v62 = vmul.f32 %v1345_v49, %v201_v34 }
  0xa5   :  { %v172_v57 = vpop.permute.xlu1 %171  ;;  %v215_v54 = vpop.permute.xlu0 %214 }
  0xa6   :  { %v174_v44 = vmul.f32 %v172_v57, %v168_v28  ;;  %v175_v53 = vmul.f32 %v172_v57, %v169_v43  ;;  %v217_v29 = vsel %vm216_vm0, %v213_v30, %v215_v54  ;;  %v218_v56 = vsel %vm216_vm0, %v215_v54, %v213_v30 }
  0xa7   :  { %v219_v10 = vmul.f32 %v1306_v20, %v217_v29  ;;  %v220_v14 = vmul.f32 %v1354_v55, %v218_v56 }
  0xa8   :  { %v176_v5 = vadd.f32 %v174_v44, %v159_v58  ;;  %v177_v57 = vadd.f32 %v175_v53, %v160_v59 }
  0xa9   :  { %v225_v24 = vmul.f32 %v223_v15, %v219_v10  ;;  %v226_v21 = vmul.f32 %v223_v15, %v220_v14 }
  0xad   :  { %v232_v13 = vpop.permute.xlu0 %231 }
  0xae   :  { %v189_v35 = vpop.permute.xlu1 %188 }
  0xaf   :  { %v191_v60 = vmul.f32 %v189_v35, %v185_v22  ;;  %v192_v61 = vmul.f32 %v189_v35, %v186_v50 }
  0xb1   :  { %v193_v17 = vadd.f32 %v191_v60, %v176_v5  ;;  %v194_v18 = vadd.f32 %v192_v61, %v177_v57 }
  0xb7   :  { %v206_v16 = vpop.permute.xlu1 %205 }
  0xb8   :  { %v208_v19 = vmul.f32 %v206_v16, %v200_v39  ;;  %v209_v23 = vmul.f32 %v206_v16, %v203_v62 }
  0xba   :  { %v210_v27 = vadd.f32 %v208_v19, %v193_v17  ;;  %v211_v30 = vadd.f32 %v209_v23, %v194_v18 }
  0xbc   :  { %v227_v33 = vadd.f32 %v225_v24, %v210_v27  ;;  %v228_v35 = vadd.f32 %v226_v21, %v211_v30 }
  0xbe   :  { %253 = vmatpush.msra.mxu0 %v227_v33  ;;  %273 = vmatpush.msra.mxu1 %v228_v35 }
  0xbf   :  { %976 = vmatmul.msk.f32.vlgmr.msra.gmra.mxu0 %vm234_vm2, %v82_v51  ;;  %977 = vmatmul.msk.f32.vlgmr.msra.gmra.mxu1 %vm234_vm2, %v82_v51 }
 0x13c   :  { %v255_v36 = vpop.f32.mrf.mxu0  ;;  %v275_v42 = vpop.f32.mrf.mxu1 }
 0x13d   :  { %v256_v25 = vadd.f32 %v255_v36, %v232_v13  ;;  %v276_v28 = vadd.f32 %v275_v42, %v232_v13 }
 0x13f   :  { %v280_v43 = vmul.f32 0.70710677, %v256_v25  ;;  %v281_v46 = vmul.f32 0.70710677, %v276_v28 }
 0x141   :  { %v282_v48 = vand.u32 2147483647, %v280_v43  ;;  %v283_v22 = vand.u32 2147483647, %v281_v46  ;;  %vm320_vm3 = vcmp.lt.f32.partialorder %v280_v43, 0.0  ;;  %vm321_vm4 = vcmp.lt.f32.partialorder %v281_v46, 0.0  ;;  %v376_v43 = vpop.permute.xlu1 %375 }
 0x143   :  { %v284_v31 = vmul.f32 0.3275911, %v282_v48  ;;  %v285_v37 = vmul.f32 0.3275911, %v283_v22  ;;  %v308_v53 = vsub.f32 0.0, %v282_v48  ;;  %v309_v56 = vsub.f32 0.0, %v283_v22 }
 0x145   :  { %v286_v50 = vadd.f32 1.0, %v284_v31  ;;  %v287_v34 = vadd.f32 1.0, %v285_v37  ;;  %v310_v60 = vmul.f32 %v308_v53, %v282_v48  ;;  %v311_v5 = vmul.f32 %v309_v56, %v283_v22 }
 0x147   :  { %1047 = vrcp.f32 %v286_v50  ;;  %v312_v14 = vmul.f32 1.442695, %v310_v60  ;;  %v314_v16 = vmul.f32 1.442695, %v311_v5  ;;  %v278_v50 = vmul.f32 0.5, %v256_v25  ;;  %v344_v25 = vpop.permute.xlu2 %343 }
 0x148   :  { %1049 = vrcp.f32 %v287_v34 }
 0x149   :  { %1051 = vpow2.f32 %v312_v14 }
 0x14a   :  { %1053 = vpow2.f32 %v314_v16  ;;  %v332_v16 = vld [vmem:[%s1737_s6] sm:$0xff] }
 0x14d   :  { %v1048_v44 = vpop.eup %1047 }
 0x14e   :  { %v1050_v54 = vpop.eup %1049  ;;  %v290_v29 = vmul.f32 1.0614054, %v1048_v44 }
 0x14f   :  { %v291_v58 = vmul.f32 1.0614054, %v1050_v54  ;;  %v1052_v33 = vpop.eup %1051 }
 0x150   :  { %v292_v59 = vadd.f32 -1.4531521, %v290_v29  ;;  %v1054_v51 = vpop.eup %1053  ;;  %v279_v29 = vmul.f32 0.5, %v276_v28  ;;  %v392_v28 = vpop.permute.xlu2 %391 }
 0x151   :  { %v293_v61 = vadd.f32 -1.4531521, %v291_v58 }
 0x152   :  { %v294_v62 = vmul.f32 %v1048_v44, %v292_v59 }
 0x153   :  { %v295_v57 = vmul.f32 %v1050_v54, %v293_v61 }
 0x154   :  { %v296_v10 = vadd.f32 1.4214138, %v294_v62 }
 0x155   :  { %v297_v39 = vadd.f32 1.4214138, %v295_v57 }
 0x156   :  { %v298_v15 = vmul.f32 %v1048_v44, %v296_v10 }
 0x157   :  { %v299_v17 = vmul.f32 %v1050_v54, %v297_v39 }
 0x158   :  { %v300_v18 = vadd.f32 -0.28449672, %v298_v15  ;;  %v1416_v46 = vpop.permute.xlu2 %399 }
 0x159   :  { %v301_v19 = vadd.f32 -0.28449672, %v299_v17  ;;  %v1426_v17 = vld [vmem:[%s1733_s1 + $0x8] sm:$0xff] }
 0x15a   :  { %v302_v23 = vmul.f32 %v1048_v44, %v300_v18 }
 0x15b   :  { %v303_v24 = vmul.f32 %v1050_v54, %v301_v19 }
 0x15c   :  { %v304_v21 = vadd.f32 0.2548296, %v302_v23 }
 0x15d   :  { %v305_v27 = vadd.f32 0.2548296, %v303_v24 }
 0x15e   :  { %v306_v30 = vmul.f32 %v1048_v44, %v304_v21 }
 0x15f   :  { %v307_v35 = vmul.f32 %v1050_v54, %v305_v27  ;;  %v360_v54 = vpop.permute.xlu0 %359 }
 0x160   :  { %v316_v13 = vmul.f32 %v1052_v33, %v306_v30  ;;  %v1418_v60 = vpop.permute.xlu2 %415 }
 0x161   :  { %v317_v36 = vmul.f32 %v1054_v51, %v307_v35 }
 0x162   :  { %v318_v42 = vsub.f32 1.0, %v316_v13 }
 0x163   :  { %v319_v48 = vsub.f32 1.0, %v317_v36 }
 0x164   :  { %v322_v22 = vsub.f32 0.0, %v318_v42 }
 0x165   :  { %v323_v31 = vsub.f32 0.0, %v319_v48 }
 0x166   :  { %v324_v37 = vsel %vm320_vm3, %v322_v22, %v318_v42 }
 0x167   :  { %v326_v34 = vadd.f32 1.0, %v324_v37  ;;  %v325_v53 = vsel %vm321_vm4, %v323_v31, %v319_v48 }
 0x168   :  { %v327_v56 = vadd.f32 1.0, %v325_v53 }
 0x169   :  { %v1374_v58 = vmul.f32 %v326_v34, %v278_v50 }
 0x16a   :  { %v1376_v44 = vmul.f32 %v327_v56, %v279_v29 }
 0x16b   :  { %366 = vrot.lane.b32.xlu0 %v1374_v58, %s1067_s28  ;;  %333 = vrot.lane.b32.xlu1 %v1374_v58, %s1066_s27 }
 0x16c   :  { %335 = vrot.lane.b32.xlu2 %v1376_v44, %s1066_s27 }
 0x173   :  { %406 = vrot.lane.b32.xlu0 %v1374_v58, %s1072_s0  ;;  %350 = vrot.lane.b32.xlu1 %v1374_v58, %s1065_s26 }
 0x174   :  { %352 = vrot.lane.b32.xlu2 %v1376_v44, %s1065_s26 }
 0x17b   :  { %422 = vrot.lane.b32.xlu0 %v1374_v58, %s1073_s11  ;;  %368 = vrot.lane.b32.xlu1 %v1376_v44, %s1067_s28 }
 0x17c   :  { %384 = vrot.lane.b32.xlu2 %v1376_v44, %s1069_s10 }
 0x183   :  { %438 = vrot.lane.b32.xlu0 %v1374_v58, %s1075_s12  ;;  %382 = vrot.lane.b32.xlu1 %v1374_v58, %s1069_s10 }
 0x184   :  { %431 = vperm.xlu2 %1023, %v1225_v38  }
 0x18b   :  { %454 = vrot.lane.b32.xlu0 %v1374_v58, %s1077_s13  ;;  %408 = vrot.lane.b32.xlu1 %v1376_v44, %s1072_s0 }
 0x18c   :  { %1024 = vset.pattern.permute.xlu2 %v1079_v12 }
 0x18d   :  { %447 = vperm.xlu2 %1024, %v1225_v38  }
 0x193   :  { %424 = vrot.lane.b32.xlu1 %v1376_v44, %s1073_s11  ;;  %463 = vperm.xlu0 %1025, %v1225_v38  }
 0x195   :  { %1028 = vset.pattern.permute.xlu2 %v1068_v3 }
 0x196   :  { %568 = vperm.xlu2 %1028, %v1426_v17  }
 0x19b   :  { %440 = vrot.lane.b32.xlu1 %v1376_v44, %s1075_s12  ;;  %1029 = vset.pattern.permute.xlu0 %v1063_v1 }
 0x19c   :  { %584 = vperm.xlu0 %1029, %v1426_v17  }
 0x19e   :  { %1035 = vset.pattern.permute.xlu2 %v1074_v8 }
 0x1a3   :  { %456 = vrot.lane.b32.xlu1 %v1376_v44, %s1077_s13 }
 0x1a4   :  { %1030 = vset.pattern.permute.xlu0 %v1070_v6 }
 0x1a5   :  { %536 = vperm.xlu0 %1030, %v1426_v17  }
 0x1ab   :  { %472 = vperm.xlu1 %1026, %v332_v16  }
 0x1b3   :  { %1027 = vset.pattern.permute.xlu1 %v1064_v2 }
 0x1b4   :  { %552 = vperm.xlu1 %1027, %v1426_v17  }
 0x1bc   :  { %1031 = vset.pattern.permute.xlu1 %v1071_v7 }
 0x1bd   :  { %592 = vperm.xlu1 %1031, %v1426_v17  }
 0x1c5   :  { %1032 = vset.pattern.permute.xlu1 %v1076_v9 }
 0x1c6   :  { %v336_v62 = vpop.permute.xlu2 %335  ;;  %608 = vperm.xlu1 %1032, %v1426_v17  }
 0x1ce   :  { %v353_v14 = vpop.permute.xlu2 %352  ;;  %1033 = vset.pattern.permute.xlu1 %v1078_v11 }
 0x1cf   :  { %624 = vperm.xlu1 %1033, %v1426_v17  }
 0x1d6   :  { %v385_v18 = vpop.permute.xlu2 %384 }
 0x1d7   :  { %1034 = vset.pattern.permute.xlu1 %v1079_v12 }
 0x1dd   :  { %v334_v59 = vpop.permute.xlu1 %333  ;;  %v367_v61 = vpop.permute.xlu0 %366 }
 0x1de   :  { %v337_v23 = vsel %vm88_vm5, %v334_v59, %v336_v62  ;;  %v338_v24 = vsel %vm88_vm5, %v336_v62, %v334_v59  ;;  %v432_v29 = vpop.permute.xlu2 %431 }
 0x1df   :  { %v339_v36 = vmul.f32 %v1232_v40, %v338_v24  ;;  %v340_v42 = vmul.f32 %v1237_v41, %v337_v23 }
 0x1e1   :  { %v346_v56 = vmul.f32 %v344_v25, %v339_v36  ;;  %v347_v59 = vmul.f32 %v344_v25, %v340_v42 }
 0x1e5   :  { %v351_v38 = vpop.permute.xlu1 %350  ;;  %v407_v57 = vpop.permute.xlu0 %406 }
 0x1e6   :  { %v355_v19 = vsel %vm106_vm7, %v353_v14, %v351_v38  ;;  %v354_v30 = vsel %vm106_vm7, %v351_v38, %v353_v14 }
 0x1e7   :  { %v356_v33 = vmul.f32 %v1253_v45, %v355_v19  ;;  %v363_v37 = vmul.f32 %v360_v54, %v354_v30 }
 0x1e9   :  { %v362_v50 = vmul.f32 %v360_v54, %v356_v33 }
 0x1ed   :  { %v369_v5 = vpop.permute.xlu1 %368  ;;  %v423_v39 = vpop.permute.xlu0 %422 }
 0x1ee   :  { %v370_v21 = vsel %vm123_vm6, %v367_v61, %v369_v5  ;;  %v371_v27 = vsel %vm123_vm6, %v369_v5, %v367_v61  ;;  %v364_v5 = vadd.f32 %v362_v50, %v346_v56 }
 0x1ef   :  { %v372_v48 = vmul.f32 %v1258_v47, %v371_v27  ;;  %v373_v22 = vmul.f32 %v1269_v52, %v370_v21 }
 0x1f1   :  { %v378_v38 = vmul.f32 %v376_v43, %v372_v48  ;;  %v379_v61 = vmul.f32 %v376_v43, %v373_v22  ;;  %v448_v22 = vpop.permute.xlu2 %447 }
 0x1f3   :  { %v380_v19 = vadd.f32 %v378_v38, %v364_v5 }
 0x1f5   :  { %v383_v10 = vpop.permute.xlu1 %382  ;;  %v439_v13 = vpop.permute.xlu0 %438 }
 0x1f6   :  { %v386_v35 = vsel %vm140_vm10, %v383_v10, %v385_v18  ;;  %v387_v51 = vsel %vm140_vm10, %v385_v18, %v383_v10  ;;  %v365_v10 = vadd.f32 %v363_v37, %v347_v59 }
 0x1f7   :  { %v388_v34 = vmul.f32 %v1282_v63, %v387_v51  ;;  %v389_v53 = vmul.f32 %v1237_v41, %v386_v35  ;;  %v403_v35 = vmul.f32 %v1416_v46, %v1376_v44 }
 0x1f8   :  { %v381_v43 = vadd.f32 %v379_v61, %v365_v10 }
 0x1f9   :  { %v394_v14 = vmul.f32 %v392_v28, %v388_v34  ;;  %v395_v16 = vmul.f32 %v392_v28, %v389_v53 }
 0x1fb   :  { %v397_v30 = vadd.f32 %v395_v16, %v381_v43 }
 0x1fd   :  { %v409_v15 = vpop.permute.xlu1 %408  ;;  %v455_v27 = vpop.permute.xlu0 %454  ;;  %v405_v37 = vadd.f32 %v403_v35, %v397_v30 }
 0x1fe   :  { %v410_v54 = vsel %vm165_vm12, %v407_v57, %v409_v15  ;;  %v411_v62 = vsel %vm165_vm12, %v409_v15, %v407_v57  ;;  %v396_v15 = vadd.f32 %v394_v14, %v380_v19 }
 0x1ff   :  { %v412_v23 = vmul.f32 %v1306_v20, %v410_v54  ;;  %v413_v24 = vmul.f32 %v1269_v52, %v411_v62 }
 0x201   :  { %v418_v51 = vmul.f32 %v1418_v60, %v412_v23  ;;  %v419_v36 = vmul.f32 %v1418_v60, %v413_v24 }
 0x203   :  { %v421_v53 = vadd.f32 %v419_v36, %v405_v37 }
 0x205   :  { %v425_v31 = vpop.permute.xlu1 %424  ;;  %v464_v38 = vpop.permute.xlu0 %463 }
 0x206   :  { %v426_v18 = vsel %vm182_vm14, %v423_v39, %v425_v31  ;;  %v427_v25 = vsel %vm182_vm14, %v425_v31, %v423_v39  ;;  %v402_v39 = vmul.f32 %v1416_v46, %v1374_v58 }
 0x207   :  { %v428_v28 = vmul.f32 %v1282_v63, %v426_v18  ;;  %v429_v33 = vmul.f32 %v1317_v32, %v427_v25  ;;  %v331_v25 = vld [vmem:[%s1738_s5] sm:$0xff] }
 0x208   :  { %v404_v31 = vadd.f32 %v402_v39, %v396_v15  ;;  %v569_v15 = vpop.permute.xlu2 %568 }
 0x209   :  { %v434_v58 = vmul.f32 %v432_v29, %v428_v28  ;;  %v435_v50 = vmul.f32 %v432_v29, %v429_v33 }
 0x20a   :  { %v420_v34 = vadd.f32 %v418_v51, %v404_v31 }
 0x20b   :  { %v437_v54 = vadd.f32 %v435_v50, %v421_v53 }
 0x20c   :  { %v436_v61 = vadd.f32 %v434_v58, %v420_v34 }
 0x20d   :  { %v441_v21 = vpop.permute.xlu1 %440 }
 0x20e   :  { %v443_v57 = vsel %vm199_vm15, %v441_v21, %v439_v13  ;;  %v442_v48 = vsel %vm199_vm15, %v439_v13, %v441_v21  ;;  %v585_v33 = vpop.permute.xlu0 %584 }
 0x20f   :  { %v445_v42 = vmul.f32 %v1345_v49, %v443_v57  ;;  %v450_v56 = vmul.f32 %v448_v22, %v442_v48 }
 0x211   :  { %v451_v44 = vmul.f32 %v448_v22, %v445_v42  ;;  %v452_v10 = vadd.f32 %v450_v56, %v436_v61 }
 0x213   :  { %v453_v14 = vadd.f32 %v451_v44, %v437_v54  ;;  %v1566_v44 = vld [vmem:[%s1735_s4 + $0x8] sm:$0xff] }
 0x215   :  { %v457_v46 = vpop.permute.xlu1 %456 }
 0x216   :  { %v458_v60 = vsel %vm216_vm0, %v455_v27, %v457_v46  ;;  %v459_v59 = vsel %vm216_vm0, %v457_v46, %v455_v27 }
 0x217   :  { %v460_v13 = vmul.f32 %v1306_v20, %v458_v60  ;;  %v461_v62 = vmul.f32 %v1354_v55, %v459_v59  ;;  %v537_v51 = vpop.permute.xlu0 %536 }
 0x219   :  { %v466_v5 = vmul.f32 %v464_v38, %v460_v13  ;;  %v467_v29 = vmul.f32 %v464_v38, %v461_v62 }
 0x21b   :  { %v468_v16 = vadd.f32 %v466_v5, %v452_v10  ;;  %v469_v18 = vadd.f32 %v467_v29, %v453_v14 }
 0x21d   :  { %493 = vmatpush.msra.mxu2 %v468_v16  ;;  %513 = vmatpush.msra.mxu3 %v469_v18  ;;  %v473_v19 = vpop.permute.xlu1 %472 }
 0x21e   :  { %978 = vmatmul.msk.f32.vlgmr.msra.gmra.mxu2 %vm234_vm2, %v331_v25  ;;  %979 = vmatmul.msk.f32.vlgmr.msra.gmra.mxu3 %vm234_vm2, %v331_v25 }
 0x2a1   :  { %v495_v43 = vpop.f32.mrf.mxu2  ;;  %v515_v23 = vpop.f32.mrf.mxu3 }
 0x2a2   :  { %v496_v24 = vadd.f32 %v495_v43, %v473_v19  ;;  %v516_v21 = vadd.f32 %v515_v23, %v473_v19 }
 0x2a4   :  { %v1500_v27 = vadd.f32 %v496_v24, %v1124_v0  ;;  %v1503_v57 = vadd.f32 %v516_v21, %v1138_v4  ;;  %v982_v0 = vld [vmem:[%s1734_s3 + $0x8] sm:$0xff]  ;;  %v553_v4 = vpop.permute.xlu1 %552 }
 0x2a6   :  { %545 = vrot.lane.b32.xlu0 %v1503_v57, %s1065_s26  ;;  %528 = vrot.lane.b32.xlu1 %v1503_v57, %s1066_s27 }
 0x2a7   :  { %526 = vrot.lane.b32.xlu2 %v1500_v27, %s1066_s27 }
 0x2ac   :  { %v1545_v30 = vpop.permute.xlu1 %592 }
 0x2ae   :  { %617 = vrot.lane.b32.xlu0 %v1503_v57, %s1073_s11  ;;  %559 = vrot.lane.b32.xlu1 %v1500_v27, %s1067_s28 }
 0x2af   :  { %543 = vrot.lane.b32.xlu2 %v1500_v27, %s1065_s26 }
 0x2b4   :  { %v1547_v28 = vpop.permute.xlu1 %608 }
 0x2b6   :  { %633 = vrot.lane.b32.xlu0 %v1503_v57, %s1075_s12  ;;  %577 = vrot.lane.b32.xlu1 %v1503_v57, %s1069_s10 }
 0x2b7   :  { %561 = vrot.lane.b32.xlu2 %v1503_v57, %s1067_s28 }
 0x2bc   :  { %v1549_v39 = vpop.permute.xlu1 %624 }
 0x2be   :  { %649 = vrot.lane.b32.xlu0 %v1503_v57, %s1077_s13  ;;  %599 = vrot.lane.b32.xlu1 %v1500_v27, %s1072_s0 }
 0x2bf   :  { %575 = vrot.lane.b32.xlu2 %v1500_v27, %s1069_s10 }
 0x2c6   :  { %665 = vperm.xlu0 %1030, %v982_v0   ;;  %640 = vperm.xlu1 %1034, %v1426_v17  }
 0x2c7   :  { %601 = vrot.lane.b32.xlu2 %v1503_v57, %s1072_s0 }
 0x2ce   :  { %1037 = vset.pattern.permute.xlu0 %v1064_v2  ;;  %1038 = vset.pattern.permute.xlu1 %v1068_v3 }
 0x2cf   :  { %615 = vrot.lane.b32.xlu2 %v1500_v27, %s1073_s11  ;;  %795 = vperm.xlu0 %1037, %v1566_v44  }
 0x2d0   :  { %811 = vperm.xlu1 %1038, %v1566_v44  }
 0x2d7   :  { %631 = vrot.lane.b32.xlu2 %v1500_v27, %s1075_s12  ;;  %1044 = vset.pattern.permute.xlu0 %v1074_v8 }
 0x2d8   :  { %1045 = vset.pattern.permute.xlu1 %v1070_v6 }
 0x2df   :  { %647 = vrot.lane.b32.xlu2 %v1500_v27, %s1077_s13 }
 0x2e7   :  { %656 = vperm.xlu2 %1035, %v1426_v17  }
 0x2ef   :  { %1036 = vset.pattern.permute.xlu2 %v1070_v6 }
 0x2f0   :  { %779 = vperm.xlu2 %1036, %v1566_v44  }
 0x2f8   :  { %1039 = vset.pattern.permute.xlu2 %v1063_v1 }
 0x2f9   :  { %827 = vperm.xlu2 %1039, %v1566_v44  }
 0x301   :  { %v527_v2 = vpop.permute.xlu2 %526  ;;  %1040 = vset.pattern.permute.xlu2 %v1071_v7 }
 0x302   :  { %835 = vperm.xlu2 %1040, %v1566_v44  }
 0x309   :  { %v544_v3 = vpop.permute.xlu2 %543 }
 0x30a   :  { %1041 = vset.pattern.permute.xlu2 %v1076_v9 }
 0x30b   :  { %851 = vperm.xlu2 %1041, %v1566_v44  }
 0x311   :  { %v562_v35 = vpop.permute.xlu2 %561 }
 0x313   :  { %1042 = vset.pattern.permute.xlu2 %v1078_v11 }
 0x318   :  { %v529_v36 = vpop.permute.xlu1 %528  ;;  %v546_v48 = vpop.permute.xlu0 %545 }
 0x319   :  { %v576_v42 = vpop.permute.xlu2 %575  ;;  %v531_v31 = vsel %vm88_vm5, %v529_v36, %v527_v2  ;;  %v548_v37 = vsel %vm106_vm7, %v546_v48, %v544_v3  ;;  %v530_v58 = vsel %vm88_vm5, %v527_v2, %v529_v36  ;;  %v547_v29 = vsel %vm106_vm7, %v544_v3, %v546_v48 }
 0x31a   :  { %v532_v50 = vmul.f32 %v1232_v40, %v531_v31  ;;  %v549_v34 = vmul.f32 %v1253_v45, %v548_v37  ;;  %v533_v46 = vmul.f32 %v1237_v41, %v530_v58  ;;  %v556_v25 = vmul.f32 %v553_v4, %v547_v29 }
 0x31b   :  { %v596_v31 = vmul.f32 %v1545_v30, %v1503_v57 }
 0x31c   :  { %v539_v5 = vmul.f32 %v537_v51, %v532_v50  ;;  %v555_v10 = vmul.f32 %v553_v4, %v549_v34  ;;  %v540_v14 = vmul.f32 %v537_v51, %v533_v46 }
 0x31e   :  { %v557_v23 = vadd.f32 %v555_v10, %v539_v5  ;;  %v558_v24 = vadd.f32 %v556_v25, %v540_v14 }
 0x320   :  { %v560_v22 = vpop.permute.xlu1 %559  ;;  %v618_v60 = vpop.permute.xlu0 %617 }
 0x321   :  { %v602_v17 = vpop.permute.xlu2 %601  ;;  %v563_v53 = vsel %vm123_vm6, %v560_v22, %v562_v35  ;;  %v564_v56 = vsel %vm123_vm6, %v562_v35, %v560_v22 }
 0x322   :  { %v565_v13 = vmul.f32 %v1258_v47, %v564_v56  ;;  %v566_v62 = vmul.f32 %v1269_v52, %v563_v53 }
 0x324   :  { %v571_v19 = vmul.f32 %v569_v15, %v565_v13  ;;  %v572_v43 = vmul.f32 %v569_v15, %v566_v62 }
 0x326   :  { %v573_v4 = vadd.f32 %v571_v19, %v557_v23  ;;  %v574_v15 = vadd.f32 %v572_v43, %v558_v24 }
 0x328   :  { %v578_v59 = vpop.permute.xlu1 %577  ;;  %v634_v36 = vpop.permute.xlu0 %633 }
 0x329   :  { %v579_v38 = vsel %vm140_vm10, %v576_v42, %v578_v59  ;;  %v580_v61 = vsel %vm140_vm10, %v578_v59, %v576_v42  ;;  %v616_v54 = vpop.permute.xlu2 %615 }
 0x32a   :  { %v581_v16 = vmul.f32 %v1282_v63, %v580_v61  ;;  %v582_v18 = vmul.f32 %v1237_v41, %v579_v38  ;;  %v619_v48 = vsel %vm182_vm14, %v616_v54, %v618_v60  ;;  %v620_v22 = vsel %vm182_vm14, %v618_v60, %v616_v54 }
 0x32b   :  { %v621_v50 = vmul.f32 %v1282_v63, %v619_v48  ;;  %v622_v34 = vmul.f32 %v1317_v32, %v620_v22 }
 0x32c   :  { %v587_v21 = vmul.f32 %v585_v33, %v581_v16  ;;  %v588_v0 = vmul.f32 %v585_v33, %v582_v18 }
 0x32d   :  { %v627_v61 = vmul.f32 %v1549_v39, %v621_v50 }
 0x32e   :  { %v589_v42 = vadd.f32 %v587_v21, %v573_v4  ;;  %v590_v8 = vadd.f32 %v588_v0, %v574_v15 }
 0x330   :  { %v600_v2 = vpop.permute.xlu1 %599  ;;  %v598_v56 = vadd.f32 %v596_v31, %v590_v8  ;;  %v650_v13 = vpop.permute.xlu0 %649 }
 0x331   :  { %v603_v3 = vsel %vm165_vm12, %v600_v2, %v602_v17  ;;  %v604_v35 = vsel %vm165_vm12, %v602_v17, %v600_v2  ;;  %v632_v51 = vpop.permute.xlu2 %631  ;;  %v595_v17 = vmul.f32 %v1545_v30, %v1500_v27  ;;  %v981_v2 = vld [vmem:[%s1736_s2 + $0x8] sm:$0xff] }
 0x332   :  { %v605_v33 = vmul.f32 %v1306_v20, %v603_v3  ;;  %v606_v1 = vmul.f32 %v1269_v52, %v604_v35  ;;  %v636_v46 = vsel %vm199_vm15, %v634_v36, %v632_v51  ;;  %v635_v62 = vsel %vm199_vm15, %v632_v51, %v634_v36 }
 0x333   :  { %v597_v53 = vadd.f32 %v595_v17, %v589_v42  ;;  %v638_v54 = vmul.f32 %v1345_v49, %v636_v46 }
 0x334   :  { %v611_v37 = vmul.f32 %v1547_v28, %v605_v33  ;;  %v612_v58 = vmul.f32 %v1547_v28, %v606_v1  ;;  %v628_v28 = vmul.f32 %v1549_v39, %v622_v34 }
 0x336   :  { %v613_v59 = vadd.f32 %v611_v37, %v597_v53  ;;  %v614_v38 = vadd.f32 %v612_v58, %v598_v56 }
 0x338   :  { %v641_v30 = vpop.permute.xlu1 %640  ;;  %v629_v14 = vadd.f32 %v627_v61, %v613_v59  ;;  %v630_v16 = vadd.f32 %v628_v28, %v614_v38  ;;  %v666_v3 = vpop.permute.xlu0 %665 }
 0x339   :  { %v648_v60 = vpop.permute.xlu2 %647  ;;  %v643_v29 = vmul.f32 %v641_v30, %v635_v62  ;;  %v644_v10 = vmul.f32 %v641_v30, %v638_v54 }
 0x33a   :  { %v651_v5 = vsel %vm216_vm0, %v648_v60, %v650_v13  ;;  %v652_v7 = vsel %vm216_vm0, %v650_v13, %v648_v60 }
 0x33b   :  { %v653_v18 = vmul.f32 %v1306_v20, %v651_v5  ;;  %v654_v39 = vmul.f32 %v1354_v55, %v652_v7  ;;  %v645_v23 = vadd.f32 %v643_v29, %v629_v14  ;;  %v646_v24 = vadd.f32 %v644_v10, %v630_v16 }
 0x341   :  { %v657_v25 = vpop.permute.xlu2 %656 }
 0x342   :  { %v659_v19 = vmul.f32 %v657_v25, %v653_v18  ;;  %v660_v43 = vmul.f32 %v657_v25, %v654_v39 }
 0x344   :  { %v661_v21 = vadd.f32 %v659_v19, %v645_v23  ;;  %v662_v0 = vadd.f32 %v660_v43, %v646_v24 }
 0x346   :  { %686 = vmatpush.msrb.mxu0 %v661_v21  ;;  %706 = vmatpush.msrb.mxu1 %v662_v0 }
 0x347   :  { %983 = vmatmul.msk.f32.vlgmr.msrb.gmra.mxu0 %vm234_vm2, %v981_v2  ;;  %984 = vmatmul.msk.f32.vlgmr.msrb.gmra.mxu1 %vm234_vm2, %v981_v2 }
 0x3c4   :  { %v688_v35 = vpop.f32.mrf.mxu0  ;;  %v708_v51 = vpop.f32.mrf.mxu1 }
 0x3c5   :  { %v689_v9 = vadd.f32 %v688_v35, %v666_v3  ;;  %v709_v4 = vadd.f32 %v708_v51, %v666_v3 }
 0x3c7   :  { %v713_v15 = vmul.f32 0.70710677, %v689_v9  ;;  %v714_v36 = vmul.f32 0.70710677, %v709_v4  ;;  %v711_v3 = vmul.f32 0.5, %v689_v9  ;;  %v780_v9 = vpop.permute.xlu2 %779 }
 0x3c9   :  { %v715_v33 = vand.u32 2147483647, %v713_v15  ;;  %v716_v1 = vand.u32 2147483647, %v714_v36  ;;  %vm753_vm8 = vcmp.lt.f32.partialorder %v713_v15, 0.0  ;;  %vm754_vm9 = vcmp.lt.f32.partialorder %v714_v36, 0.0  ;;  %v812_v15 = vpop.permute.xlu1 %811 }
 0x3cb   :  { %v717_v42 = vmul.f32 0.3275911, %v715_v33  ;;  %v718_v8 = vmul.f32 0.3275911, %v716_v1  ;;  %v741_v31 = vsub.f32 0.0, %v715_v33  ;;  %v742_v11 = vsub.f32 0.0, %v716_v1 }
 0x3cd   :  { %v719_v48 = vadd.f32 1.0, %v717_v42  ;;  %v720_v22 = vadd.f32 1.0, %v718_v8  ;;  %v743_v53 = vmul.f32 %v741_v31, %v715_v33  ;;  %v744_v60 = vmul.f32 %v742_v11, %v716_v1 }
 0x3ce   :  { %v712_v33 = vmul.f32 0.5, %v709_v4 }
 0x3cf   :  { %1055 = vrcp.f32 %v719_v48  ;;  %v745_v30 = vmul.f32 1.442695, %v743_v53  ;;  %v747_v54 = vmul.f32 1.442695, %v744_v60  ;;  %v828_v4 = vpop.permute.xlu2 %827 }
 0x3d0   :  { %1057 = vrcp.f32 %v720_v22 }
 0x3d1   :  { %1059 = vpow2.f32 %v745_v30 }
 0x3d2   :  { %1061 = vpow2.f32 %v747_v54 }
 0x3d5   :  { %v1056_v17 = vpop.eup %1055 }
 0x3d6   :  { %v1058_v37 = vpop.eup %1057  ;;  %v723_v58 = vmul.f32 1.0614054, %v1056_v17 }
 0x3d7   :  { %v724_v50 = vmul.f32 1.0614054, %v1058_v37  ;;  %v1060_v18 = vpop.eup %1059  ;;  %v836_v36 = vpop.permute.xlu2 %835 }
 0x3d8   :  { %v725_v34 = vadd.f32 -1.4531521, %v723_v58  ;;  %v1062_v25 = vpop.eup %1061 }
 0x3d9   :  { %v726_v56 = vadd.f32 -1.4531521, %v724_v50 }
 0x3da   :  { %v727_v46 = vmul.f32 %v1056_v17, %v725_v34 }
 0x3db   :  { %v728_v59 = vmul.f32 %v1058_v37, %v726_v56 }
 0x3dc   :  { %v729_v38 = vadd.f32 1.4214138, %v727_v46 }
 0x3dd   :  { %v730_v61 = vadd.f32 1.4214138, %v728_v59 }
 0x3de   :  { %v731_v28 = vmul.f32 %v1056_v17, %v729_v38 }
 0x3df   :  { %v732_v13 = vmul.f32 %v1058_v37, %v730_v61  ;;  %v852_v22 = vpop.permute.xlu2 %851 }
 0x3e0   :  { %v733_v62 = vadd.f32 -0.28449672, %v731_v28 }
 0x3e1   :  { %v734_v5 = vadd.f32 -0.28449672, %v732_v13 }
 0x3e2   :  { %v735_v7 = vmul.f32 %v1056_v17, %v733_v62 }
 0x3e3   :  { %v736_v29 = vmul.f32 %v1058_v37, %v734_v5 }
 0x3e4   :  { %v737_v10 = vadd.f32 0.2548296, %v735_v7 }
 0x3e5   :  { %v738_v14 = vadd.f32 0.2548296, %v736_v29 }
 0x3e6   :  { %v739_v16 = vmul.f32 %v1056_v17, %v737_v10 }
 0x3e7   :  { %v740_v39 = vmul.f32 %v1058_v37, %v738_v14 }
 0x3e8   :  { %v749_v19 = vmul.f32 %v1060_v18, %v739_v16 }
 0x3e9   :  { %v750_v43 = vmul.f32 %v1062_v25, %v740_v39 }
 0x3ea   :  { %v751_v23 = vsub.f32 1.0, %v749_v19 }
 0x3eb   :  { %v752_v24 = vsub.f32 1.0, %v750_v43 }
 0x3ec   :  { %v755_v21 = vsub.f32 0.0, %v751_v23 }
 0x3ed   :  { %v756_v0 = vsub.f32 0.0, %v752_v24 }
 0x3ee   :  { %v757_v2 = vsel %vm753_vm8, %v755_v21, %v751_v23 }
 0x3ef   :  { %v759_v35 = vadd.f32 1.0, %v757_v2  ;;  %v758_v51 = vsel %vm754_vm9, %v756_v0, %v752_v24 }
 0x3f0   :  { %v760_v1 = vadd.f32 1.0, %v758_v51 }
 0x3f1   :  { %v1627_v42 = vmul.f32 %v759_v35, %v711_v3 }
 0x3f2   :  { %v1629_v8 = vmul.f32 %v760_v1, %v712_v33 }
 0x3f3   :  { %802 = vrot.lane.b32.xlu0 %v1627_v42, %s1067_s28  ;;  %769 = vrot.lane.b32.xlu1 %v1627_v42, %s1066_s27 }
 0x3f4   :  { %771 = vrot.lane.b32.xlu2 %v1629_v8, %s1066_s27 }
 0x3fb   :  { %842 = vrot.lane.b32.xlu0 %v1627_v42, %s1072_s0  ;;  %786 = vrot.lane.b32.xlu1 %v1627_v42, %s1065_s26 }
 0x3fc   :  { %788 = vrot.lane.b32.xlu2 %v1629_v8, %s1065_s26 }
 0x403   :  { %858 = vrot.lane.b32.xlu0 %v1627_v42, %s1073_s11  ;;  %804 = vrot.lane.b32.xlu1 %v1629_v8, %s1067_s28 }
 0x404   :  { %820 = vrot.lane.b32.xlu2 %v1629_v8, %s1069_s10 }
 0x40b   :  { %874 = vrot.lane.b32.xlu0 %v1627_v42, %s1075_s12  ;;  %818 = vrot.lane.b32.xlu1 %v1627_v42, %s1069_s10 }
 0x40c   :  { %867 = vperm.xlu2 %1042, %v1566_v44  }
 0x413   :  { %890 = vrot.lane.b32.xlu0 %v1627_v42, %s1077_s13  ;;  %844 = vrot.lane.b32.xlu1 %v1629_v8, %s1072_s0 }
 0x414   :  { %1043 = vset.pattern.permute.xlu2 %v1079_v12  ;;  %v796_v12 = vpop.permute.xlu0 %795 }
 0x415   :  { %883 = vperm.xlu2 %1043, %v1566_v44  }
 0x41b   :  { %860 = vrot.lane.b32.xlu1 %v1629_v8, %s1073_s11  ;;  %899 = vperm.xlu0 %1044, %v1566_v44  }
 0x423   :  { %876 = vrot.lane.b32.xlu1 %v1629_v8, %s1075_s12  ;;  %1046 = vset.pattern.permute.xlu0 %v1070_v6  ;;  %v987_v6 = vld [vmem:[%s1737_s6 + $0x8] sm:$0xff] }
 0x42b   :  { %892 = vrot.lane.b32.xlu1 %v1629_v8, %s1077_s13 }
 0x433   :  { %908 = vperm.xlu1 %1045, %v987_v6  }
 0x44e   :  { %v772_v37 = vpop.permute.xlu2 %771 }
 0x456   :  { %v789_v50 = vpop.permute.xlu2 %788 }
 0x45e   :  { %v821_v56 = vpop.permute.xlu2 %820 }
 0x465   :  { %v770_v48 = vpop.permute.xlu1 %769  ;;  %v803_v31 = vpop.permute.xlu0 %802 }
 0x466   :  { %v773_v60 = vsel %vm88_vm5, %v770_v48, %v772_v37  ;;  %v774_v59 = vsel %vm88_vm5, %v772_v37, %v770_v48  ;;  %v868_v25 = vpop.permute.xlu2 %867 }
 0x467   :  { %v775_v5 = vmul.f32 %v1232_v40, %v774_v59  ;;  %v776_v7 = vmul.f32 %v1237_v41, %v773_v60 }
 0x469   :  { %v782_v19 = vmul.f32 %v780_v9, %v775_v5  ;;  %v783_v43 = vmul.f32 %v780_v9, %v776_v7 }
 0x46d   :  { %v787_v17 = vpop.permute.xlu1 %786  ;;  %v843_v44 = vpop.permute.xlu0 %842 }
 0x46e   :  { %v791_v46 = vsel %vm106_vm7, %v789_v50, %v787_v17  ;;  %v790_v28 = vsel %vm106_vm7, %v787_v17, %v789_v50 }
 0x46f   :  { %v792_v61 = vmul.f32 %v1253_v45, %v791_v46  ;;  %v799_v16 = vmul.f32 %v796_v12, %v790_v28 }
 0x471   :  { %v798_v45 = vmul.f32 %v796_v12, %v792_v61  ;;  %v801_v0 = vadd.f32 %v799_v16, %v783_v43 }
 0x473   :  { %v800_v21 = vadd.f32 %v798_v45, %v782_v19 }
 0x475   :  { %v805_v58 = vpop.permute.xlu1 %804  ;;  %v859_v34 = vpop.permute.xlu0 %858 }
 0x476   :  { %v806_v38 = vsel %vm123_vm6, %v803_v31, %v805_v58  ;;  %v807_v30 = vsel %vm123_vm6, %v805_v58, %v803_v31  ;;  %v838_v58 = vmul.f32 %v836_v36, %v1627_v42 }
 0x477   :  { %v808_v29 = vmul.f32 %v1258_v47, %v807_v30  ;;  %v809_v10 = vmul.f32 %v1269_v52, %v806_v38 }
 0x479   :  { %v814_v23 = vmul.f32 %v812_v15, %v808_v29  ;;  %v815_v24 = vmul.f32 %v812_v15, %v809_v10  ;;  %v986_v10 = vld [vmem:[%s1738_s5 + $0x8] sm:$0xff] }
 0x47b   :  { %v816_v51 = vadd.f32 %v814_v23, %v800_v21  ;;  %v817_v33 = vadd.f32 %v815_v24, %v801_v0 }
 0x47d   :  { %v819_v11 = vpop.permute.xlu1 %818  ;;  %v875_v62 = vpop.permute.xlu0 %874 }
 0x47e   :  { %v822_v54 = vsel %vm140_vm10, %v819_v11, %v821_v56  ;;  %v823_v13 = vsel %vm140_vm10, %v821_v56, %v819_v11 }
 0x47f   :  { %v824_v18 = vmul.f32 %v1282_v63, %v823_v13  ;;  %v825_v39 = vmul.f32 %v1237_v41, %v822_v54 }
 0x481   :  { %v830_v2 = vmul.f32 %v828_v4, %v824_v18  ;;  %v831_v3 = vmul.f32 %v828_v4, %v825_v39 }
 0x483   :  { %v832_v17 = vadd.f32 %v830_v2, %v816_v51  ;;  %v833_v31 = vadd.f32 %v831_v3, %v817_v33 }
 0x485   :  { %v845_v53 = vpop.permute.xlu1 %844  ;;  %v891_v12 = vpop.permute.xlu0 %890  ;;  %v840_v6 = vadd.f32 %v838_v58, %v832_v17 }
 0x486   :  { %v846_v40 = vsel %vm165_vm12, %v843_v44, %v845_v53  ;;  %v847_v47 = vsel %vm165_vm12, %v845_v53, %v843_v44  ;;  %v839_v44 = vmul.f32 %v836_v36, %v1629_v8 }
 0x487   :  { %v848_v1 = vmul.f32 %v1306_v20, %v846_v40  ;;  %v849_v9 = vmul.f32 %v1269_v52, %v847_v47  ;;  %v884_v52 = vpop.permute.xlu2 %883 }
 0x488   :  { %v841_v56 = vadd.f32 %v839_v44, %v833_v31 }
 0x489   :  { %v854_v11 = vmul.f32 %v852_v22, %v848_v1  ;;  %v855_v50 = vmul.f32 %v852_v22, %v849_v9 }
 0x48b   :  { %v856_v59 = vadd.f32 %v854_v11, %v840_v6 }
 0x48d   :  { %v861_v14 = vpop.permute.xlu1 %860 }
 0x48e   :  { %v862_v35 = vsel %vm182_vm14, %v859_v34, %v861_v14  ;;  %v863_v41 = vsel %vm182_vm14, %v861_v14, %v859_v34 }
 0x48f   :  { %v864_v4 = vmul.f32 %v1282_v63, %v862_v35  ;;  %v865_v37 = vmul.f32 %v1317_v32, %v863_v41  ;;  %v857_v63 = vadd.f32 %v855_v50, %v841_v56 }
 0x491   :  { %v870_v46 = vmul.f32 %v868_v25, %v864_v4  ;;  %v871_v60 = vmul.f32 %v868_v25, %v865_v37 }
 0x493   :  { %v872_v36 = vadd.f32 %v870_v46, %v856_v59  ;;  %v873_v22 = vadd.f32 %v871_v60, %v857_v63 }
 0x495   :  { %v877_v15 = vpop.permute.xlu1 %876 }
 0x496   :  { %v879_v48 = vsel %vm199_vm15, %v877_v15, %v875_v62  ;;  %v878_v53 = vsel %vm199_vm15, %v875_v62, %v877_v15 }
 0x497   :  { %v881_v34 = vmul.f32 %v1345_v49, %v879_v48  ;;  %v886_v38 = vmul.f32 %v884_v52, %v878_v53  ;;  %v900_v49 = vpop.permute.xlu0 %899 }
 0x499   :  { %v887_v32 = vmul.f32 %v884_v52, %v881_v34  ;;  %v888_v54 = vadd.f32 %v886_v38, %v872_v36 }
 0x49b   :  { %v889_v13 = vadd.f32 %v887_v32, %v873_v22 }
 0x49d   :  { %v893_v30 = vpop.permute.xlu1 %892 }
 0x49e   :  { %v894_v42 = vsel %vm216_vm0, %v891_v12, %v893_v30  ;;  %v895_v8 = vsel %vm216_vm0, %v893_v30, %v891_v12 }
 0x49f   :  { %v896_v61 = vmul.f32 %v1306_v20, %v894_v42  ;;  %v897_v28 = vmul.f32 %v1354_v55, %v895_v8 }
 0x4a1   :  { %v902_v62 = vmul.f32 %v900_v49, %v896_v61  ;;  %v903_v5 = vmul.f32 %v900_v49, %v897_v28 }
 0x4a3   :  { %v904_v7 = vadd.f32 %v902_v62, %v888_v54  ;;  %v905_v29 = vadd.f32 %v903_v5, %v889_v13 }
 0x4a5   :  { %929 = vmatpush.msrb.mxu2 %v904_v7  ;;  %949 = vmatpush.msrb.mxu3 %v905_v29  ;;  %v909_v26 = vpop.permute.xlu1 %908 }
 0x4a6   :  { %988 = vmatmul.msk.f32.vlgmr.msrb.gmra.mxu2 %vm234_vm2, %v986_v10  ;;  %989 = vmatmul.msk.f32.vlgmr.msrb.gmra.mxu3 %vm234_vm2, %v986_v10 }
 0x529   :  { %v931_v20 = vpop.f32.mrf.mxu2  ;;  %v951_v14 = vpop.f32.mrf.mxu3 }
 0x52a   :  { %v932_v55 = vadd.f32 %v931_v20, %v909_v26  ;;  %v952_v45 = vadd.f32 %v951_v14, %v909_v26 }
 0x52c   :  { %v954_v16 = vadd.f32 %v932_v55, %v1500_v27  ;;  %v955_v18 = vadd.f32 %v952_v45, %v1503_v57 }
 0x52e   :  { %956 = vst [vmem:[%s1739_s7] sm:$0xff] %v954_v16 }
 0x52f   :  { %957 = vst [vmem:[%s1739_s7 + $0x8] sm:$0xff] %v955_v18 }

</bundles_post_ra>
